<compile_context>
chip_gen: v7x
topology: tpu7x:2x2x1
jax: 0.10.0
libtpu: 0.0.40
codegen_flags: <defaults>
</compile_context>

<pallas_src>
import functools
import math

import jax
import jax.numpy as jnp
import numpy as np
from jax.experimental import pallas as pl
from jax.experimental.pallas import tpu as pltpu


# ---------------------------------------------------------------------------
# Pallas kernel: one batch-block per grid step, weights resident in VMEM.
# ---------------------------------------------------------------------------
def _block_kernel(x_ref, ctx_ref, *refs, num_heads, head_dim, scale,
                  has_bias, compute_dtype, mlp_chunk):
    if has_bias:
        ab_ref = refs[0]          # (TB, H, N1, N2), caller dtype (bf16/f32)
        refs = refs[1:]
    else:
        ab_ref = None
    (ncw_ref, ncb_ref,
     wq_ref, bq_ref, wkv_ref, bkv_ref, wo_ref, bo_ref,
     w1_ref, b1_ref, w2_ref, b2_ref,
     out_ref) = refs

    TB, N1, C = x_ref.shape
    _, N2, _ = ctx_ref.shape
    H, D = num_heads, head_dim
    rows_q = TB * N1
    rows_k = TB * N2

    # Flatten batch+seq (leading-dim fold only; last dim preserved).
    x = x_ref[...].astype(jnp.float32).reshape(rows_q, C)
    ctx = ctx_ref[...].astype(jnp.float32).reshape(rows_k, C)

    def layer_norm(v, eps):
        mu = jnp.mean(v, axis=-1, keepdims=True)
        var = jnp.mean((v - mu) ** 2, axis=-1, keepdims=True)
        return (v - mu) * jax.lax.rsqrt(var + eps)

    # norm1 (no affine, eps=1e-6) / norm_context (affine, eps=1e-5)
    xn = layer_norm(x, 1e-6).astype(compute_dtype)
    ctxn = (layer_norm(ctx, 1e-5) * ncw_ref[...] + ncb_ref[...]).astype(compute_dtype)

    def softmax_attend(qh, kh, vh, bias):
        # qh (TB,N1,D), kh/vh (TB,N2,D) in compute dtype; bias (TB,N1,N2) or None
        sim = jnp.einsum('bqd,bkd->bqk', qh, kh,
                         preferred_element_type=jnp.float32) * scale
        if bias is not None:
            sim = sim + bias.astype(jnp.float32)     # upcast at the add only
        sim = sim - jnp.max(sim, axis=-1, keepdims=True)
        p = jnp.exp(sim)
        p = p * pl.reciprocal(jnp.sum(p, axis=-1, keepdims=True), approx=True)
        return jnp.einsum('bqk,bkd->bqd', p.astype(compute_dtype), vh,
                          preferred_element_type=jnp.float32)   # (TB, N1, D)

    if H == 1:
        # Fused K/V projection (one (C, 2C) matmul).
        q = jnp.dot(xn, wq_ref[...], preferred_element_type=jnp.float32) + bq_ref[...]
        kv = jnp.dot(ctxn, wkv_ref[...], preferred_element_type=jnp.float32) + bkv_ref[...]
        k = kv[:, :C]
        v = kv[:, C:]
        bias = ab_ref[:, 0] if has_bias else None
        o = softmax_attend(q.astype(compute_dtype).reshape(TB, N1, C),
                           k.astype(compute_dtype).reshape(TB, N2, C),
                           v.astype(compute_dtype).reshape(TB, N2, C),
                           bias)
        y = (jnp.dot(o.reshape(rows_q, C).astype(compute_dtype), wo_ref[...],
                     preferred_element_type=jnp.float32) + bo_ref[...])
    else:
        # Heads via static slices of the *weight* refs; per-head output is folded
        # straight into the Wo projection (accumulated) -> no activation lane
        # slices, no concatenate, no 4-D transposes.
        y = jnp.zeros((rows_q, C), jnp.float32)
        for h in range(H):
            lo = h * D
            q_h = (jnp.dot(xn, wq_ref[:, lo:lo + D],
                           preferred_element_type=jnp.float32)
                   + bq_ref[:, lo:lo + D])
            k_h = (jnp.dot(ctxn, wkv_ref[:, lo:lo + D],
                           preferred_element_type=jnp.float32)
                   + bkv_ref[:, lo:lo + D])
            v_h = (jnp.dot(ctxn, wkv_ref[:, C + lo:C + lo + D],
                           preferred_element_type=jnp.float32)
                   + bkv_ref[:, C + lo:C + lo + D])
            bias_h = ab_ref[:, h] if has_bias else None
            o_h = softmax_attend(q_h.astype(compute_dtype).reshape(TB, N1, D),
                                 k_h.astype(compute_dtype).reshape(TB, N2, D),
                                 v_h.astype(compute_dtype).reshape(TB, N2, D),
                                 bias_h)
            y = y + jnp.dot(o_h.reshape(rows_q, D).astype(compute_dtype),
                            wo_ref[lo:lo + D, :],
                            preferred_element_type=jnp.float32)
        y = y + bo_ref[...]

    # Residual 1 (f32).
    x1 = x + y

    # norm2 + MLP (Linear -> GELU(tanh) -> Linear), chunked over the hidden dim
    # so f32 intermediates stay small on 64-MiB-VMEM chips.
    xn2 = layer_norm(x1, 1e-6).astype(compute_dtype)
    mlp_hidden = w1_ref.shape[1]
    c0 = 0.7978845608028654  # sqrt(2/pi)
    mlp_out = jnp.zeros((rows_q, C), jnp.float32)
    for lo in range(0, mlp_hidden, mlp_chunk):
        hi = min(lo + mlp_chunk, mlp_hidden)
        h1 = (jnp.dot(xn2, w1_ref[:, lo:hi],
                      preferred_element_type=jnp.float32) + b1_ref[:, lo:hi])
        g = 0.5 * h1 * (1.0 + jnp.tanh(c0 * (h1 + 0.044715 * h1 * h1 * h1)))
        mlp_out = mlp_out + jnp.dot(g.astype(compute_dtype), w2_ref[lo:hi, :],
                                    preferred_element_type=jnp.float32)
    mlp_out = mlp_out + b2_ref[...]

    out_ref[...] = (x1 + mlp_out).reshape(TB, N1, C).astype(out_ref.dtype)


# ---------------------------------------------------------------------------
# Wrapper helpers
# ---------------------------------------------------------------------------
def _device_profile():
    """Generation-aware sizing (rows-per-block target, scoped-VMEM budget)."""
    try:
        kind = jax.devices()[0].device_kind.lower()
    except Exception:
        kind = ""
    if any(t in kind for t in ("v4", "v5", "v6")):
        # 128 MiB VMEM per TensorCore -> bigger blocks, generous scoped limit.
        return {"target_rows": 1024, "vmem_limit_bytes": 96 * 1024 * 1024}
    # v7x (64 MiB VMEM/TC) and unknown chips: stay conservative.
    return {"target_rows": 256, "vmem_limit_bytes": 48 * 1024 * 1024}


def _pick_batch_block(B, N1, target_rows, min_grid_steps=2):
    """Largest TB with TB*N1 <= target_rows, but keep >= min_grid_steps grid steps
    when possible so the 'parallel' axis can shard across v7x's two TensorCores."""
    tb = max(1, target_rows // max(N1, 1))
    if B >= min_grid_steps:
        tb = min(tb, pl.cdiv(B, min_grid_steps))
    return max(1, min(tb, B))


def _cost_estimate(B, N1, N2, C, H, mlp_hidden, stream_args, weight_args):
    flops = 2 * B * N1 * C * C                   # Q projection
    flops += 2 * B * N2 * C * (2 * C)            # fused K/V projection
    flops += 2 * 2 * B * N1 * N2 * C             # q@k^T and attn@v (all heads)
    flops += 2 * B * N1 * C * C                  # output projection
    flops += 2 * 2 * B * N1 * C * mlp_hidden     # MLP
    transcendentals = B * H * N1 * N2            # softmax exp
    transcendentals += B * N1 * mlp_hidden       # GELU tanh
    transcendentals += B * (2 * N1 + N2)         # layernorm rsqrt
    bytes_accessed = sum(int(a.size) * a.dtype.itemsize
                         for a in (stream_args + weight_args))
    bytes_accessed += B * N1 * C * 4             # output write
    return pl.CostEstimate(flops=int(flops), transcendentals=int(transcendentals),
                           bytes_accessed=int(bytes_accessed))


# ---------------------------------------------------------------------------
# Wrapper
# ---------------------------------------------------------------------------
def upsample_cross_attn_block(x, context, params, *, num_heads=1,
                              attn_bias=None, compute_dtype=jnp.bfloat16,
                              batch_block=None):
    # TODO(synk): for real deployments pad C (and head_dim) to multiples of 128 in
    # the wrapper so stores are lane-dense and the MXU is fully filled.
    B, N1, C = x.shape
    _, N2, _ = context.shape
    assert C % num_heads == 0
    head_dim = C // num_heads
    scale = 1.0 / math.sqrt(head_dim)
    mlp_hidden = params["w1"].shape[1]
    mlp_chunk = min(mlp_hidden, 1024)

    prof = _device_profile()
    TB = batch_block if batch_block is not None else _pick_batch_block(
        B, N1, prof["target_rows"])
    n_blocks = pl.cdiv(B, TB)
    Bp = n_blocks * TB

    # Pad the batch (instead of asserting divisibility); padded rows are sliced off.
    xp, ctxp, biasp = x, context, attn_bias
    if Bp != B:
        pad3 = ((0, Bp - B), (0, 0), (0, 0))
        xp = jnp.pad(x, pad3)
        ctxp = jnp.pad(context, pad3)
        if attn_bias is not None:
            biasp = jnp.pad(attn_bias, ((0, Bp - B), (0, 0), (0, 0), (0, 0)))

    cd = compute_dtype
    wq = params["wq"].astype(cd)
    wkv = jnp.concatenate([params["wk"], params["wv"]], axis=1).astype(cd)
    bkv = jnp.concatenate([params["bk"], params["bv"]], axis=1).astype(jnp.float32)
    wo = params["wo"].astype(cd)
    w1 = params["w1"].astype(cd)
    w2 = params["w2"].astype(cd)

    has_bias = attn_bias is not None

    kernel = functools.partial(
        _block_kernel, num_heads=num_heads, head_dim=head_dim, scale=scale,
        has_bias=has_bias, compute_dtype=cd, mlp_chunk=mlp_chunk)

    # attn_bias is streamed 4-D in the caller's dtype (no reshape/astype copy).
    stream_args = [xp, ctxp] + ([biasp] if has_bias else [])
    weight_args = [
        params["norm_ctx_w"].astype(jnp.float32),
        params["norm_ctx_b"].astype(jnp.float32),
        wq, params["bq"].astype(jnp.float32),
        wkv, bkv,
        wo, params["bo"].astype(jnp.float32),
        w1, params["b1"].astype(jnp.float32),
        w2, params["b2"].astype(jnp.float32),
    ]
    weight_shapes = [(1, C), (1, C),
                     (C, C), (1, C),
                     (C, 2 * C), (1, 2 * C),
                     (C, C), (1, C),
                     (C, mlp_hidden), (1, mlp_hidden),
                     (mlp_hidden, C), (1, C)]

    cost = _cost_estimate(B, N1, N2, C, num_heads, mlp_hidden,
                          stream_args, weight_args)

    def build(single_buffer_weights):
        def const_spec(shape):
            n = len(shape)
            idx = lambda b, _n=n: (0,) * _n
            if single_buffer_weights:
                # Weights never change block index -> a second buffer is pure waste.
                return pl.BlockSpec(shape, idx, pipeline_mode=pl.Buffered(1))
            return pl.BlockSpec(shape, idx)

        in_specs = [
            pl.BlockSpec((TB, N1, C), lambda b: (b, 0, 0)),        # x
            pl.BlockSpec((TB, N2, C), lambda b: (b, 0, 0)),        # context
        ]
        if has_bias:
            in_specs.append(
                pl.BlockSpec((TB, num_heads, N1, N2), lambda b: (b, 0, 0, 0)))
        in_specs += [const_spec(s) for s in weight_shapes]

        grid_spec = pltpu.PrefetchScalarGridSpec(
            num_scalar_prefetch=0,
            grid=(n_blocks,),
            in_specs=in_specs,
            out_specs=pl.BlockSpec((TB, N1, C), lambda b: (b, 0, 0)),
        )
        return pl.pallas_call(
            kernel,
            out_shape=jax.ShapeDtypeStruct((Bp, N1, C), x.dtype),
            grid_spec=grid_spec,
            compiler_params=pltpu.CompilerParams(
                dimension_semantics=("parallel",),
                vmem_limit_bytes=prof["vmem_limit_bytes"]),
            cost_estimate=cost,
        )

    args = stream_args + weight_args
    try:
        out = build(single_buffer_weights=True)(*args)
    except Exception:
        # TODO(synk): remove this fallback once pl.Buffered(1) single-buffering of
        # resident weights is guaranteed on every deployed jax version.
        out = build(single_buffer_weights=False)(*args)

    return out if Bp == B else out[:B]


# ---------------------------------------------------------------------------
# Pure-JAX f32 reference (same math) for a sanity check
# ---------------------------------------------------------------------------
def reference(x, context, params, *, num_heads=1, attn_bias=None):
    B, N1, C = x.shape
    _, N2, _ = context.shape
    D = C // num_heads
    scale = 1.0 / math.sqrt(D)

    def ln(v, eps):
        mu = jnp.mean(v, axis=-1, keepdims=True)
        var = jnp.mean((v - mu) ** 2, axis=-1, keepdims=True)
        return (v - mu) / jnp.sqrt(var + eps)

    xn = ln(x, 1e-6)
    ctxn = ln(context, 1e-5) * params["norm_ctx_w"] + params["norm_ctx_b"]
    q = xn @ params["wq"] + params["bq"]
    k = ctxn @ params["wk"] + params["bk"]
    v = ctxn @ params["wv"] + params["bv"]
    q = q.reshape(B, N1, num_heads, D).transpose(0, 2, 1, 3)
    k = k.reshape(B, N2, num_heads, D).transpose(0, 2, 1, 3)
    v = v.reshape(B, N2, num_heads, D).transpose(0, 2, 1, 3)
    sim = jnp.einsum("bhqd,bhkd->bhqk", q, k) * scale
    if attn_bias is not None:
        sim = sim + attn_bias
    attn = jax.nn.softmax(sim, axis=-1)
    o = jnp.einsum("bhqk,bhkd->bhqd", attn, v).transpose(0, 2, 1, 3).reshape(B, N1, C)
    y = o @ params["wo"] + params["bo"]
    x1 = x + y
    xn2 = ln(x1, 1e-6)
    h1 = xn2 @ params["w1"] + params["b1"]
    c0 = 0.7978845608028654
    g = 0.5 * h1 * (1.0 + jnp.tanh(c0 * (h1 + 0.044715 * h1 ** 3)))
    return x1 + (g @ params["w2"] + params["b2"])


# ---------------------------------------------------------------------------
# Main
# ---------------------------------------------------------------------------
if __name__ == "__main__":
    B, N1, N2, C = 2, 16, 8, 32
    mlp_hidden = int(C * 4.0)

    key = jax.random.PRNGKey(0)
    keys = jax.random.split(key, 20)

    def w(k, shape, s=0.05):
        return (s * jax.random.normal(k, shape)).astype(jnp.float32)

    params = {
        "norm_ctx_w": jnp.ones((1, C), jnp.float32),
        "norm_ctx_b": jnp.zeros((1, C), jnp.float32),
        "wq": w(keys[0], (C, C)), "bq": w(keys[1], (1, C)),
        "wk": w(keys[2], (C, C)), "bk": w(keys[3], (1, C)),
        "wv": w(keys[4], (C, C)), "bv": w(keys[5], (1, C)),
        "wo": w(keys[6], (C, C)), "bo": w(keys[7], (1, C)),
        "w1": w(keys[8], (C, mlp_hidden)), "b1": w(keys[9], (1, mlp_hidden)),
        "w2": w(keys[10], (mlp_hidden, C)), "b2": w(keys[11], (1, C)),
    }

    x = jax.random.normal(keys[12], (B, N1, C), dtype=jnp.float32)
    context = jax.random.normal(keys[13], (B, N2, C), dtype=jnp.float32)

    # 1) num_heads=1, attn_bias streamed in bf16 (caller-provided dtype).
    bias1 = (0.1 * jax.random.normal(keys[14], (B, 1, N1, N2))).astype(jnp.bfloat16)
    out1 = jax.block_until_ready(
        upsample_cross_attn_block(x, context, params, num_heads=1, attn_bias=bias1))
    ref1 = reference(x, context, params, num_heads=1,
                     attn_bias=bias1.astype(jnp.float32))
    np.testing.assert_allclose(np.asarray(out1), np.asarray(ref1),
                               rtol=2e-2, atol=2e-2)

    # 2) num_heads=2: exercises the per-head weight-slice path (no concat/transpose).
    bias2 = 0.1 * jax.random.normal(keys[15], (B, 2, N1, N2), dtype=jnp.float32)
    out2 = jax.block_until_ready(
        upsample_cross_attn_block(x, context, params, num_heads=2, attn_bias=bias2))
    ref2 = reference(x, context, params, num_heads=2, attn_bias=bias2)
    np.testing.assert_allclose(np.asarray(out2), np.asarray(ref2),
                               rtol=2e-2, atol=2e-2)

    # 3) odd batch (exercises tail padding), no attn_bias (bias-free variant).
    B3 = 3
    x3 = jax.random.normal(keys[16], (B3, N1, C), dtype=jnp.float32)
    c3 = jax.random.normal(keys[17], (B3, N2, C), dtype=jnp.float32)
    out3 = jax.block_until_ready(
        upsample_cross_attn_block(x3, c3, params, num_heads=1, attn_bias=None))
    ref3 = reference(x3, c3, params, num_heads=1, attn_bias=None)
    np.testing.assert_allclose(np.asarray(out3), np.asarray(ref3),
                               rtol=2e-2, atol=2e-2)

    print("KERNEL_OK")
</pallas_src>

<mosaic_0001>
module attributes {stable_mosaic.version = 11 : i64} {
  func.func @_block_kernel(%arg0: i32, %arg1: memref<1x16x32xf32, #tpu.memory_space<vmem>>, %arg2: memref<1x8x32xf32, #tpu.memory_space<vmem>>, %arg3: memref<1x1x16x8xbf16, #tpu.memory_space<vmem>>, %arg4: memref<1x32xf32, #tpu.memory_space<vmem>>, %arg5: memref<1x32xf32, #tpu.memory_space<vmem>>, %arg6: memref<32x32xbf16, #tpu.memory_space<vmem>>, %arg7: memref<1x32xf32, #tpu.memory_space<vmem>>, %arg8: memref<32x64xbf16, #tpu.memory_space<vmem>>, %arg9: memref<1x64xf32, #tpu.memory_space<vmem>>, %arg10: memref<32x32xbf16, #tpu.memory_space<vmem>>, %arg11: memref<1x32xf32, #tpu.memory_space<vmem>>, %arg12: memref<32x128xbf16, #tpu.memory_space<vmem>>, %arg13: memref<1x128xf32, #tpu.memory_space<vmem>>, %arg14: memref<128x32xbf16, #tpu.memory_space<vmem>>, %arg15: memref<1x32xf32, #tpu.memory_space<vmem>>, %arg16: memref<1x16x32xf32, #tpu.memory_space<vmem>>) attributes {dimension_semantics = [#tpu.dimension_semantics<parallel>], iteration_bounds = array<i64: 2>, scalar_prefetch = 0 : i64, scratch_operands = 0 : i64, tpu.core_type = #tpu.core_type<tc>, window_params = [{transform_indices = @transform_0, window_bounds = array<i64: 1, 16, 32>}, {transform_indices = @transform_1, window_bounds = array<i64: 1, 8, 32>}, {transform_indices = @transform_2, window_bounds = array<i64: 1, 1, 16, 8>}, {pipeline_mode = #tpu.pipeline_mode<synchronous>, transform_indices = @transform_3, window_bounds = array<i64: 1, 32>}, {pipeline_mode = #tpu.pipeline_mode<synchronous>, transform_indices = @transform_4, window_bounds = array<i64: 1, 32>}, {pipeline_mode = #tpu.pipeline_mode<synchronous>, transform_indices = @transform_5, window_bounds = array<i64: 32, 32>}, {pipeline_mode = #tpu.pipeline_mode<synchronous>, transform_indices = @transform_6, window_bounds = array<i64: 1, 32>}, {pipeline_mode = #tpu.pipeline_mode<synchronous>, transform_indices = @transform_7, window_bounds = array<i64: 32, 64>}, {pipeline_mode = #tpu.pipeline_mode<synchronous>, transform_indices = @transform_8, window_bounds = array<i64: 1, 64>}, {pipeline_mode = #tpu.pipeline_mode<synchronous>, transform_indices = @transform_9, window_bounds = array<i64: 32, 32>}, {pipeline_mode = #tpu.pipeline_mode<synchronous>, transform_indices = @transform_10, window_bounds = array<i64: 1, 32>}, {pipeline_mode = #tpu.pipeline_mode<synchronous>, transform_indices = @transform_11, window_bounds = array<i64: 32, 128>}, {pipeline_mode = #tpu.pipeline_mode<synchronous>, transform_indices = @transform_12, window_bounds = array<i64: 1, 128>}, {pipeline_mode = #tpu.pipeline_mode<synchronous>, transform_indices = @transform_13, window_bounds = array<i64: 128, 32>}, {pipeline_mode = #tpu.pipeline_mode<synchronous>, transform_indices = @transform_14, window_bounds = array<i64: 1, 32>}, {transform_indices = @transform_15, window_bounds = array<i64: 1, 16, 32>}]} {
    %c0 = arith.constant 0 : index
    %c0_0 = arith.constant 0 : index
    %c0_1 = arith.constant 0 : index
    %0 = vector.load %arg1[%c0, %c0_0, %c0_1] : memref<1x16x32xf32, #tpu.memory_space<vmem>>, vector<1x16x32xf32>
    %1 = vector.shape_cast %0 : vector<1x16x32xf32> to vector<16x32xf32>
    %c0_2 = arith.constant 0 : index
    %c0_3 = arith.constant 0 : index
    %c0_4 = arith.constant 0 : index
    %2 = vector.load %arg2[%c0_2, %c0_3, %c0_4] : memref<1x8x32xf32, #tpu.memory_space<vmem>>, vector<1x8x32xf32>
    %3 = vector.shape_cast %2 : vector<1x8x32xf32> to vector<8x32xf32>
    %cst = arith.constant dense<0.000000e+00> : vector<16xf32>
    %4 = vector.multi_reduction <add>, %1, %cst [1] : vector<16x32xf32> to vector<16xf32>
    %5 = vector.shape_cast %4 : vector<16xf32> to vector<16x1xf32>
    %cst_5 = arith.constant 3.200000e+01 : f32
    %6 = vector.broadcast %cst_5 : f32 to vector<16x1xf32>
    %7 = arith.divf %5, %6 : vector<16x1xf32>
    %8 = vector.broadcast %7 : vector<16x1xf32> to vector<16x32xf32>
    %9 = arith.subf %1, %8 : vector<16x32xf32>
    %10 = arith.mulf %9, %9 : vector<16x32xf32>
    %cst_6 = arith.constant dense<0.000000e+00> : vector<16xf32>
    %11 = vector.multi_reduction <add>, %10, %cst_6 [1] : vector<16x32xf32> to vector<16xf32>
    %12 = vector.shape_cast %11 : vector<16xf32> to vector<16x1xf32>
    %cst_7 = arith.constant 3.200000e+01 : f32
    %13 = vector.broadcast %cst_7 : f32 to vector<16x1xf32>
    %14 = arith.divf %12, %13 : vector<16x1xf32>
    %15 = vector.broadcast %7 : vector<16x1xf32> to vector<16x32xf32>
    %16 = arith.subf %1, %15 : vector<16x32xf32>
    %cst_8 = arith.constant 9.99999997E-7 : f32
    %17 = vector.broadcast %cst_8 : f32 to vector<16x1xf32>
    %18 = arith.addf %14, %17 : vector<16x1xf32>
    %19 = math.rsqrt %18 : vector<16x1xf32>
    %20 = vector.broadcast %19 : vector<16x1xf32> to vector<16x32xf32>
    %21 = arith.mulf %16, %20 : vector<16x32xf32>
    %22 = arith.truncf %21 : vector<16x32xf32> to vector<16x32xbf16>
    %cst_9 = arith.constant dense<0.000000e+00> : vector<8xf32>
    %23 = vector.multi_reduction <add>, %3, %cst_9 [1] : vector<8x32xf32> to vector<8xf32>
    %24 = vector.shape_cast %23 : vector<8xf32> to vector<8x1xf32>
    %cst_10 = arith.constant 3.200000e+01 : f32
    %25 = vector.broadcast %cst_10 : f32 to vector<8x1xf32>
    %26 = arith.divf %24, %25 : vector<8x1xf32>
    %27 = vector.broadcast %26 : vector<8x1xf32> to vector<8x32xf32>
    %28 = arith.subf %3, %27 : vector<8x32xf32>
    %29 = arith.mulf %28, %28 : vector<8x32xf32>
    %cst_11 = arith.constant dense<0.000000e+00> : vector<8xf32>
    %30 = vector.multi_reduction <add>, %29, %cst_11 [1] : vector<8x32xf32> to vector<8xf32>
    %31 = vector.shape_cast %30 : vector<8xf32> to vector<8x1xf32>
    %cst_12 = arith.constant 3.200000e+01 : f32
    %32 = vector.broadcast %cst_12 : f32 to vector<8x1xf32>
    %33 = arith.divf %31, %32 : vector<8x1xf32>
    %34 = vector.broadcast %26 : vector<8x1xf32> to vector<8x32xf32>
    %35 = arith.subf %3, %34 : vector<8x32xf32>
    %cst_13 = arith.constant 9.99999974E-6 : f32
    %36 = vector.broadcast %cst_13 : f32 to vector<8x1xf32>
    %37 = arith.addf %33, %36 : vector<8x1xf32>
    %38 = math.rsqrt %37 : vector<8x1xf32>
    %39 = vector.broadcast %38 : vector<8x1xf32> to vector<8x32xf32>
    %40 = arith.mulf %35, %39 : vector<8x32xf32>
    %c0_14 = arith.constant 0 : index
    %c0_15 = arith.constant 0 : index
    %41 = vector.load %arg4[%c0_14, %c0_15] : memref<1x32xf32, #tpu.memory_space<vmem>>, vector<1x32xf32>
    %42 = vector.broadcast %41 : vector<1x32xf32> to vector<8x32xf32>
    %43 = arith.mulf %40, %42 : vector<8x32xf32>
    %c0_16 = arith.constant 0 : index
    %c0_17 = arith.constant 0 : index
    %44 = vector.load %arg5[%c0_16, %c0_17] : memref<1x32xf32, #tpu.memory_space<vmem>>, vector<1x32xf32>
    %45 = vector.broadcast %44 : vector<1x32xf32> to vector<8x32xf32>
    %46 = arith.addf %43, %45 : vector<8x32xf32>
    %47 = arith.truncf %46 : vector<8x32xf32> to vector<8x32xbf16>
    %c0_18 = arith.constant 0 : index
    %c0_19 = arith.constant 0 : index
    %48 = vector.load %arg6[%c0_18, %c0_19] : memref<32x32xbf16, #tpu.memory_space<vmem>>, vector<32x32xbf16>
    %cst_20 = arith.constant dense<0.000000e+00> : vector<16x32xf32>
    %49 = tpu.matmul %22, %48, %cst_20 {dimension_numbers = #tpu.dot_dimension_numbers<[1], [0], [0], [1], [0, 0, 1, 1], [], []>} : vector<16x32xbf16>, vector<32x32xbf16>, vector<16x32xf32> -> vector<16x32xf32>
    %c0_21 = arith.constant 0 : index
    %c0_22 = arith.constant 0 : index
    %50 = vector.load %arg7[%c0_21, %c0_22] : memref<1x32xf32, #tpu.memory_space<vmem>>, vector<1x32xf32>
    %51 = vector.broadcast %50 : vector<1x32xf32> to vector<16x32xf32>
    %52 = arith.addf %49, %51 : vector<16x32xf32>
    %c0_23 = arith.constant 0 : index
    %c0_24 = arith.constant 0 : index
    %53 = vector.load %arg8[%c0_23, %c0_24] : memref<32x64xbf16, #tpu.memory_space<vmem>>, vector<32x64xbf16>
    %cst_25 = arith.constant dense<0.000000e+00> : vector<8x64xf32>
    %54 = tpu.matmul %47, %53, %cst_25 {dimension_numbers = #tpu.dot_dimension_numbers<[1], [0], [0], [1], [0, 0, 1, 1], [], []>} : vector<8x32xbf16>, vector<32x64xbf16>, vector<8x64xf32> -> vector<8x64xf32>
    %c0_26 = arith.constant 0 : index
    %c0_27 = arith.constant 0 : index
    %55 = vector.load %arg9[%c0_26, %c0_27] : memref<1x64xf32, #tpu.memory_space<vmem>>, vector<1x64xf32>
    %56 = vector.broadcast %55 : vector<1x64xf32> to vector<8x64xf32>
    %57 = arith.addf %54, %56 : vector<8x64xf32>
    %58 = vector.extract_strided_slice %57 {offsets = [0, 0], sizes = [8, 32], strides = [1, 1]} : vector<8x64xf32> to vector<8x32xf32>
    %59 = vector.extract_strided_slice %57 {offsets = [0, 32], sizes = [8, 32], strides = [1, 1]} : vector<8x64xf32> to vector<8x32xf32>
    %c0_28 = arith.constant 0 : index
    %c0_29 = arith.constant 0 : index
    %c0_30 = arith.constant 0 : index
    %c0_31 = arith.constant 0 : index
    %60 = vector.load %arg3[%c0_28, %c0_29, %c0_30, %c0_31] : memref<1x1x16x8xbf16, #tpu.memory_space<vmem>>, vector<1x1x16x8xbf16>
    %61 = vector.shape_cast %60 : vector<1x1x16x8xbf16> to vector<1x16x8xbf16>
    %62 = arith.truncf %52 : vector<16x32xf32> to vector<16x32xbf16>
    %63 = vector.shape_cast %62 : vector<16x32xbf16> to vector<1x16x32xbf16>
    %64 = arith.truncf %58 : vector<8x32xf32> to vector<8x32xbf16>
    %65 = vector.shape_cast %64 : vector<8x32xbf16> to vector<1x8x32xbf16>
    %66 = arith.truncf %59 : vector<8x32xf32> to vector<8x32xbf16>
    %67 = vector.shape_cast %66 : vector<8x32xbf16> to vector<1x8x32xbf16>
    "tpu.trace_start"() <{level = 10 : i32, message = "bqd,bkd->bqk"}> : () -> ()
    %cst_32 = arith.constant dense<0.000000e+00> : vector<1x16x8xf32>
    %68 = tpu.matmul %63, %65, %cst_32 {dimension_numbers = #tpu.dot_dimension_numbers<[2], [2], [1], [1], [0, 0, 0, 1, 1, 1], [0], [0]>} : vector<1x16x32xbf16>, vector<1x8x32xbf16>, vector<1x16x8xf32> -> vector<1x16x8xf32>
    "tpu.trace_stop"() : () -> ()
    %cst_33 = arith.constant 0.176776692 : f32
    %69 = vector.broadcast %cst_33 : f32 to vector<1x16x8xf32>
    %70 = arith.mulf %68, %69 : vector<1x16x8xf32>
    %71 = arith.extf %61 : vector<1x16x8xbf16> to vector<1x16x8xf32>
    %72 = arith.addf %70, %71 : vector<1x16x8xf32>
    %cst_34 = arith.constant dense<0xFF800000> : vector<1x16xf32>
    %73 = vector.multi_reduction <maximumf>, %72, %cst_34 [2] : vector<1x16x8xf32> to vector<1x16xf32>
    %74 = vector.shape_cast %73 : vector<1x16xf32> to vector<1x16x1xf32>
    %75 = vector.broadcast %74 : vector<1x16x1xf32> to vector<1x16x8xf32>
    %76 = arith.subf %72, %75 : vector<1x16x8xf32>
    %77 = math.exp %76 : vector<1x16x8xf32>
    %cst_35 = arith.constant dense<0.000000e+00> : vector<1x16xf32>
    %78 = vector.multi_reduction <add>, %77, %cst_35 [2] : vector<1x16x8xf32> to vector<1x16xf32>
    %79 = vector.shape_cast %78 : vector<1x16xf32> to vector<1x16x1xf32>
    %80 = tpu.reciprocal %79 {approx = true} : vector<1x16x1xf32> -> vector<1x16x1xf32>
    %81 = vector.broadcast %80 : vector<1x16x1xf32> to vector<1x16x8xf32>
    %82 = arith.mulf %77, %81 : vector<1x16x8xf32>
    %83 = arith.truncf %82 : vector<1x16x8xf32> to vector<1x16x8xbf16>
    "tpu.trace_start"() <{level = 10 : i32, message = "bqk,bkd->bqd"}> : () -> ()
    %cst_36 = arith.constant dense<0.000000e+00> : vector<1x16x32xf32>
    %84 = tpu.matmul %83, %67, %cst_36 {dimension_numbers = #tpu.dot_dimension_numbers<[2], [1], [1], [2], [0, 0, 0, 1, 1, 2], [0], [0]>} : vector<1x16x8xbf16>, vector<1x8x32xbf16>, vector<1x16x32xf32> -> vector<1x16x32xf32>
    "tpu.trace_stop"() : () -> ()
    %85 = vector.shape_cast %84 : vector<1x16x32xf32> to vector<16x32xf32>
    %86 = arith.truncf %85 : vector<16x32xf32> to vector<16x32xbf16>
    %c0_37 = arith.constant 0 : index
    %c0_38 = arith.constant 0 : index
    %87 = vector.load %arg10[%c0_37, %c0_38] : memref<32x32xbf16, #tpu.memory_space<vmem>>, vector<32x32xbf16>
    %cst_39 = arith.constant dense<0.000000e+00> : vector<16x32xf32>
    %88 = tpu.matmul %86, %87, %cst_39 {dimension_numbers = #tpu.dot_dimension_numbers<[1], [0], [0], [1], [0, 0, 1, 1], [], []>} : vector<16x32xbf16>, vector<32x32xbf16>, vector<16x32xf32> -> vector<16x32xf32>
    %c0_40 = arith.constant 0 : index
    %c0_41 = arith.constant 0 : index
    %89 = vector.load %arg11[%c0_40, %c0_41] : memref<1x32xf32, #tpu.memory_space<vmem>>, vector<1x32xf32>
    %90 = vector.broadcast %89 : vector<1x32xf32> to vector<16x32xf32>
    %91 = arith.addf %88, %90 : vector<16x32xf32>
    %92 = arith.addf %1, %91 : vector<16x32xf32>
    %cst_42 = arith.constant dense<0.000000e+00> : vector<16xf32>
    %93 = vector.multi_reduction <add>, %92, %cst_42 [1] : vector<16x32xf32> to vector<16xf32>
    %94 = vector.shape_cast %93 : vector<16xf32> to vector<16x1xf32>
    %cst_43 = arith.constant 3.200000e+01 : f32
    %95 = vector.broadcast %cst_43 : f32 to vector<16x1xf32>
    %96 = arith.divf %94, %95 : vector<16x1xf32>
    %97 = vector.broadcast %96 : vector<16x1xf32> to vector<16x32xf32>
    %98 = arith.subf %92, %97 : vector<16x32xf32>
    %99 = arith.mulf %98, %98 : vector<16x32xf32>
    %cst_44 = arith.constant dense<0.000000e+00> : vector<16xf32>
    %100 = vector.multi_reduction <add>, %99, %cst_44 [1] : vector<16x32xf32> to vector<16xf32>
    %101 = vector.shape_cast %100 : vector<16xf32> to vector<16x1xf32>
    %cst_45 = arith.constant 3.200000e+01 : f32
    %102 = vector.broadcast %cst_45 : f32 to vector<16x1xf32>
    %103 = arith.divf %101, %102 : vector<16x1xf32>
    %104 = vector.broadcast %96 : vector<16x1xf32> to vector<16x32xf32>
    %105 = arith.subf %92, %104 : vector<16x32xf32>
    %cst_46 = arith.constant 9.99999997E-7 : f32
    %106 = vector.broadcast %cst_46 : f32 to vector<16x1xf32>
    %107 = arith.addf %103, %106 : vector<16x1xf32>
    %108 = math.rsqrt %107 : vector<16x1xf32>
    %109 = vector.broadcast %108 : vector<16x1xf32> to vector<16x32xf32>
    %110 = arith.mulf %105, %109 : vector<16x32xf32>
    %111 = arith.truncf %110 : vector<16x32xf32> to vector<16x32xbf16>
    %cst_47 = arith.constant 0.000000e+00 : f32
    %112 = vector.broadcast %cst_47 : f32 to vector<16x32xf32>
    %c0_48 = arith.constant 0 : index
    %c0_49 = arith.constant 0 : index
    %113 = vector.load %arg12[%c0_48, %c0_49] : memref<32x128xbf16, #tpu.memory_space<vmem>>, vector<32x128xbf16>
    %cst_50 = arith.constant dense<0.000000e+00> : vector<16x128xf32>
    %114 = tpu.matmul %111, %113, %cst_50 {dimension_numbers = #tpu.dot_dimension_numbers<[1], [0], [0], [1], [0, 0, 1, 1], [], []>} : vector<16x32xbf16>, vector<32x128xbf16>, vector<16x128xf32> -> vector<16x128xf32>
    %c0_51 = arith.constant 0 : index
    %c0_52 = arith.constant 0 : index
    %115 = vector.load %arg13[%c0_51, %c0_52] : memref<1x128xf32, #tpu.memory_space<vmem>>, vector<1x128xf32>
    %116 = vector.broadcast %115 : vector<1x128xf32> to vector<16x128xf32>
    %117 = arith.addf %114, %116 : vector<16x128xf32>
    %cst_53 = arith.constant 5.000000e-01 : f32
    %118 = vector.broadcast %cst_53 : f32 to vector<16x128xf32>
    %119 = arith.mulf %118, %117 : vector<16x128xf32>
    %cst_54 = arith.constant 4.471500e-02 : f32
    %120 = vector.broadcast %cst_54 : f32 to vector<16x128xf32>
    %121 = arith.mulf %120, %117 : vector<16x128xf32>
    %122 = arith.mulf %121, %117 : vector<16x128xf32>
    %123 = arith.mulf %122, %117 : vector<16x128xf32>
    %124 = arith.addf %117, %123 : vector<16x128xf32>
    %cst_55 = arith.constant 0.797884583 : f32
    %125 = vector.broadcast %cst_55 : f32 to vector<16x128xf32>
    %126 = arith.mulf %125, %124 : vector<16x128xf32>
    %127 = math.tanh %126 : vector<16x128xf32>
    %cst_56 = arith.constant 1.000000e+00 : f32
    %128 = vector.broadcast %cst_56 : f32 to vector<16x128xf32>
    %129 = arith.addf %128, %127 : vector<16x128xf32>
    %130 = arith.mulf %119, %129 : vector<16x128xf32>
    %131 = arith.truncf %130 : vector<16x128xf32> to vector<16x128xbf16>
    %c0_57 = arith.constant 0 : index
    %c0_58 = arith.constant 0 : index
    %132 = vector.load %arg14[%c0_57, %c0_58] : memref<128x32xbf16, #tpu.memory_space<vmem>>, vector<128x32xbf16>
    %cst_59 = arith.constant dense<0.000000e+00> : vector<16x32xf32>
    %133 = tpu.matmul %131, %132, %cst_59 {dimension_numbers = #tpu.dot_dimension_numbers<[1], [0], [0], [1], [0, 0, 1, 1], [], []>} : vector<16x128xbf16>, vector<128x32xbf16>, vector<16x32xf32> -> vector<16x32xf32>
    %134 = arith.addf %112, %133 : vector<16x32xf32>
    %c0_60 = arith.constant 0 : index
    %c0_61 = arith.constant 0 : index
    %135 = vector.load %arg15[%c0_60, %c0_61] : memref<1x32xf32, #tpu.memory_space<vmem>>, vector<1x32xf32>
    %136 = vector.broadcast %135 : vector<1x32xf32> to vector<16x32xf32>
    %137 = arith.addf %134, %136 : vector<16x32xf32>
    %138 = arith.addf %92, %137 : vector<16x32xf32>
    %139 = vector.shape_cast %138 : vector<16x32xf32> to vector<1x16x32xf32>
    %c0_62 = arith.constant 0 : index
    %c0_63 = arith.constant 0 : index
    %c0_64 = arith.constant 0 : index
    %140 = vector.load %arg16[%c0_62, %c0_63, %c0_64] : memref<1x16x32xf32, #tpu.memory_space<vmem>>, vector<1x16x32xf32>
    tpu.vector_store %arg16[%c0_62, %c0_63, %c0_64], %139 {strides = array<i32>} : memref<1x16x32xf32, #tpu.memory_space<vmem>>, vector<1x16x32xf32>,
    return
  }
  func.func @transform_0(%arg0: i32) -> (i32, i32, i32) {
    %c0_i32 = arith.constant 0 : i32
    %c0_i32_0 = arith.constant 0 : i32
    %c0_i32_1 = arith.constant 0 : i32
    return %arg0, %c0_i32, %c0_i32_0 : i32, i32, i32
  }
  func.func @transform_1(%arg0: i32) -> (i32, i32, i32) {
    %c0_i32 = arith.constant 0 : i32
    %c0_i32_0 = arith.constant 0 : i32
    %c0_i32_1 = arith.constant 0 : i32
    return %arg0, %c0_i32, %c0_i32_0 : i32, i32, i32
  }
  func.func @transform_2(%arg0: i32) -> (i32, i32, i32, i32) {
    %c0_i32 = arith.constant 0 : i32
    %c0_i32_0 = arith.constant 0 : i32
    %c0_i32_1 = arith.constant 0 : i32
    %c0_i32_2 = arith.constant 0 : i32
    return %arg0, %c0_i32, %c0_i32_0, %c0_i32_1 : i32, i32, i32, i32
  }
  func.func @transform_3(%arg0: i32) -> (i32, i32) {
    %c0_i32 = arith.constant 0 : i32
    %c0_i32_0 = arith.constant 0 : i32
    %c0_i32_1 = arith.constant 0 : i32
    return %c0_i32, %c0_i32_0 : i32, i32
  }
  func.func @transform_4(%arg0: i32) -> (i32, i32) {
    %c0_i32 = arith.constant 0 : i32
    %c0_i32_0 = arith.constant 0 : i32
    %c0_i32_1 = arith.constant 0 : i32
    return %c0_i32, %c0_i32_0 : i32, i32
  }
  func.func @transform_5(%arg0: i32) -> (i32, i32) {
    %c0_i32 = arith.constant 0 : i32
    %c0_i32_0 = arith.constant 0 : i32
    %c0_i32_1 = arith.constant 0 : i32
    return %c0_i32, %c0_i32_0 : i32, i32
  }
  func.func @transform_6(%arg0: i32) -> (i32, i32) {
    %c0_i32 = arith.constant 0 : i32
    %c0_i32_0 = arith.constant 0 : i32
    %c0_i32_1 = arith.constant 0 : i32
    return %c0_i32, %c0_i32_0 : i32, i32
  }
  func.func @transform_7(%arg0: i32) -> (i32, i32) {
    %c0_i32 = arith.constant 0 : i32
    %c0_i32_0 = arith.constant 0 : i32
    %c0_i32_1 = arith.constant 0 : i32
    return %c0_i32, %c0_i32_0 : i32, i32
  }
  func.func @transform_8(%arg0: i32) -> (i32, i32) {
    %c0_i32 = arith.constant 0 : i32
    %c0_i32_0 = arith.constant 0 : i32
    %c0_i32_1 = arith.constant 0 : i32
    return %c0_i32, %c0_i32_0 : i32, i32
  }
  func.func @transform_9(%arg0: i32) -> (i32, i32) {
    %c0_i32 = arith.constant 0 : i32
    %c0_i32_0 = arith.constant 0 : i32
    %c0_i32_1 = arith.constant 0 : i32
    return %c0_i32, %c0_i32_0 : i32, i32
  }
  func.func @transform_10(%arg0: i32) -> (i32, i32) {
    %c0_i32 = arith.constant 0 : i32
    %c0_i32_0 = arith.constant 0 : i32
    %c0_i32_1 = arith.constant 0 : i32
    return %c0_i32, %c0_i32_0 : i32, i32
  }
  func.func @transform_11(%arg0: i32) -> (i32, i32) {
    %c0_i32 = arith.constant 0 : i32
    %c0_i32_0 = arith.constant 0 : i32
    %c0_i32_1 = arith.constant 0 : i32
    return %c0_i32, %c0_i32_0 : i32, i32
  }
  func.func @transform_12(%arg0: i32) -> (i32, i32) {
    %c0_i32 = arith.constant 0 : i32
    %c0_i32_0 = arith.constant 0 : i32
    %c0_i32_1 = arith.constant 0 : i32
    return %c0_i32, %c0_i32_0 : i32, i32
  }
  func.func @transform_13(%arg0: i32) -> (i32, i32) {
    %c0_i32 = arith.constant 0 : i32
    %c0_i32_0 = arith.constant 0 : i32
    %c0_i32_1 = arith.constant 0 : i32
    return %c0_i32, %c0_i32_0 : i32, i32
  }
  func.func @transform_14(%arg0: i32) -> (i32, i32) {
    %c0_i32 = arith.constant 0 : i32
    %c0_i32_0 = arith.constant 0 : i32
    %c0_i32_1 = arith.constant 0 : i32
    return %c0_i32, %c0_i32_0 : i32, i32
  }
  func.func @transform_15(%arg0: i32) -> (i32, i32, i32) {
    %c0_i32 = arith.constant 0 : i32
    %c0_i32_0 = arith.constant 0 : i32
    %c0_i32_1 = arith.constant 0 : i32
    return %arg0, %c0_i32, %c0_i32_0 : i32, i32, i32
  }
}

module attributes {stable_mosaic.version = 11 : i64} {
  func.func @_block_kernel(%arg0: i32, %arg1: memref<1x16x32xf32, #tpu.memory_space<vmem>>, %arg2: memref<1x8x32xf32, #tpu.memory_space<vmem>>, %arg3: memref<1x1x16x8xbf16, #tpu.memory_space<vmem>>, %arg4: memref<1x32xf32, #tpu.memory_space<vmem>>, %arg5: memref<1x32xf32, #tpu.memory_space<vmem>>, %arg6: memref<32x32xbf16, #tpu.memory_space<vmem>>, %arg7: memref<1x32xf32, #tpu.memory_space<vmem>>, %arg8: memref<32x64xbf16, #tpu.memory_space<vmem>>, %arg9: memref<1x64xf32, #tpu.memory_space<vmem>>, %arg10: memref<32x32xbf16, #tpu.memory_space<vmem>>, %arg11: memref<1x32xf32, #tpu.memory_space<vmem>>, %arg12: memref<32x128xbf16, #tpu.memory_space<vmem>>, %arg13: memref<1x128xf32, #tpu.memory_space<vmem>>, %arg14: memref<128x32xbf16, #tpu.memory_space<vmem>>, %arg15: memref<1x32xf32, #tpu.memory_space<vmem>>, %arg16: memref<1x16x32xf32, #tpu.memory_space<vmem>>) attributes {dimension_semantics = [#tpu.dimension_semantics<parallel>], iteration_bounds = array<i64: 2>, scalar_prefetch = 0 : i64, scratch_operands = 0 : i64, tpu.core_type = #tpu.core_type<tc>, window_params = [{transform_indices = @transform_0, window_bounds = array<i64: 1, 16, 32>}, {transform_indices = @transform_1, window_bounds = array<i64: 1, 8, 32>}, {transform_indices = @transform_2, window_bounds = array<i64: 1, 1, 16, 8>}, {pipeline_mode = #tpu.pipeline_mode<synchronous>, transform_indices = @transform_3, window_bounds = array<i64: 1, 32>}, {pipeline_mode = #tpu.pipeline_mode<synchronous>, transform_indices = @transform_4, window_bounds = array<i64: 1, 32>}, {pipeline_mode = #tpu.pipeline_mode<synchronous>, transform_indices = @transform_5, window_bounds = array<i64: 32, 32>}, {pipeline_mode = #tpu.pipeline_mode<synchronous>, transform_indices = @transform_6, window_bounds = array<i64: 1, 32>}, {pipeline_mode = #tpu.pipeline_mode<synchronous>, transform_indices = @transform_7, window_bounds = array<i64: 32, 64>}, {pipeline_mode = #tpu.pipeline_mode<synchronous>, transform_indices = @transform_8, window_bounds = array<i64: 1, 64>}, {pipeline_mode = #tpu.pipeline_mode<synchronous>, transform_indices = @transform_9, window_bounds = array<i64: 32, 32>}, {pipeline_mode = #tpu.pipeline_mode<synchronous>, transform_indices = @transform_10, window_bounds = array<i64: 1, 32>}, {pipeline_mode = #tpu.pipeline_mode<synchronous>, transform_indices = @transform_11, window_bounds = array<i64: 32, 128>}, {pipeline_mode = #tpu.pipeline_mode<synchronous>, transform_indices = @transform_12, window_bounds = array<i64: 1, 128>}, {pipeline_mode = #tpu.pipeline_mode<synchronous>, transform_indices = @transform_13, window_bounds = array<i64: 128, 32>}, {pipeline_mode = #tpu.pipeline_mode<synchronous>, transform_indices = @transform_14, window_bounds = array<i64: 1, 32>}, {transform_indices = @transform_15, window_bounds = array<i64: 1, 16, 32>}]} {
    %c0 = arith.constant 0 : index
    %c0_0 = arith.constant 0 : index
    %c0_1 = arith.constant 0 : index
    %0 = vector.load %arg1[%c0, %c0_0, %c0_1] : memref<1x16x32xf32, #tpu.memory_space<vmem>>, vector<1x16x32xf32>
    %1 = vector.shape_cast %0 : vector<1x16x32xf32> to vector<16x32xf32>
    %c0_2 = arith.constant 0 : index
    %c0_3 = arith.constant 0 : index
    %c0_4 = arith.constant 0 : index
    %2 = vector.load %arg2[%c0_2, %c0_3, %c0_4] : memref<1x8x32xf32, #tpu.memory_space<vmem>>, vector<1x8x32xf32>
    %3 = vector.shape_cast %2 : vector<1x8x32xf32> to vector<8x32xf32>
    %cst = arith.constant dense<0.000000e+00> : vector<16xf32>
    %4 = vector.multi_reduction <add>, %1, %cst [1] : vector<16x32xf32> to vector<16xf32>
    %5 = vector.shape_cast %4 : vector<16xf32> to vector<16x1xf32>
    %cst_5 = arith.constant 3.200000e+01 : f32
    %6 = vector.broadcast %cst_5 : f32 to vector<16x1xf32>
    %7 = arith.divf %5, %6 : vector<16x1xf32>
    %8 = vector.broadcast %7 : vector<16x1xf32> to vector<16x32xf32>
    %9 = arith.subf %1, %8 : vector<16x32xf32>
    %10 = arith.mulf %9, %9 : vector<16x32xf32>
    %cst_6 = arith.constant dense<0.000000e+00> : vector<16xf32>
    %11 = vector.multi_reduction <add>, %10, %cst_6 [1] : vector<16x32xf32> to vector<16xf32>
    %12 = vector.shape_cast %11 : vector<16xf32> to vector<16x1xf32>
    %cst_7 = arith.constant 3.200000e+01 : f32
    %13 = vector.broadcast %cst_7 : f32 to vector<16x1xf32>
    %14 = arith.divf %12, %13 : vector<16x1xf32>
    %15 = vector.broadcast %7 : vector<16x1xf32> to vector<16x32xf32>
    %16 = arith.subf %1, %15 : vector<16x32xf32>
    %cst_8 = arith.constant 9.99999997E-7 : f32
    %17 = vector.broadcast %cst_8 : f32 to vector<16x1xf32>
    %18 = arith.addf %14, %17 : vector<16x1xf32>
    %19 = math.rsqrt %18 : vector<16x1xf32>
    %20 = vector.broadcast %19 : vector<16x1xf32> to vector<16x32xf32>
    %21 = arith.mulf %16, %20 : vector<16x32xf32>
    %22 = arith.truncf %21 : vector<16x32xf32> to vector<16x32xbf16>
    %cst_9 = arith.constant dense<0.000000e+00> : vector<8xf32>
    %23 = vector.multi_reduction <add>, %3, %cst_9 [1] : vector<8x32xf32> to vector<8xf32>
    %24 = vector.shape_cast %23 : vector<8xf32> to vector<8x1xf32>
    %cst_10 = arith.constant 3.200000e+01 : f32
    %25 = vector.broadcast %cst_10 : f32 to vector<8x1xf32>
    %26 = arith.divf %24, %25 : vector<8x1xf32>
    %27 = vector.broadcast %26 : vector<8x1xf32> to vector<8x32xf32>
    %28 = arith.subf %3, %27 : vector<8x32xf32>
    %29 = arith.mulf %28, %28 : vector<8x32xf32>
    %cst_11 = arith.constant dense<0.000000e+00> : vector<8xf32>
    %30 = vector.multi_reduction <add>, %29, %cst_11 [1] : vector<8x32xf32> to vector<8xf32>
    %31 = vector.shape_cast %30 : vector<8xf32> to vector<8x1xf32>
    %cst_12 = arith.constant 3.200000e+01 : f32
    %32 = vector.broadcast %cst_12 : f32 to vector<8x1xf32>
    %33 = arith.divf %31, %32 : vector<8x1xf32>
    %34 = vector.broadcast %26 : vector<8x1xf32> to vector<8x32xf32>
    %35 = arith.subf %3, %34 : vector<8x32xf32>
    %cst_13 = arith.constant 9.99999974E-6 : f32
    %36 = vector.broadcast %cst_13 : f32 to vector<8x1xf32>
    %37 = arith.addf %33, %36 : vector<8x1xf32>
    %38 = math.rsqrt %37 : vector<8x1xf32>
    %39 = vector.broadcast %38 : vector<8x1xf32> to vector<8x32xf32>
    %40 = arith.mulf %35, %39 : vector<8x32xf32>
    %c0_14 = arith.constant 0 : index
    %c0_15 = arith.constant 0 : index
    %41 = vector.load %arg4[%c0_14, %c0_15] : memref<1x32xf32, #tpu.memory_space<vmem>>, vector<1x32xf32>
    %42 = vector.broadcast %41 : vector<1x32xf32> to vector<8x32xf32>
    %43 = arith.mulf %40, %42 : vector<8x32xf32>
    %c0_16 = arith.constant 0 : index
    %c0_17 = arith.constant 0 : index
    %44 = vector.load %arg5[%c0_16, %c0_17] : memref<1x32xf32, #tpu.memory_space<vmem>>, vector<1x32xf32>
    %45 = vector.broadcast %44 : vector<1x32xf32> to vector<8x32xf32>
    %46 = arith.addf %43, %45 : vector<8x32xf32>
    %47 = arith.truncf %46 : vector<8x32xf32> to vector<8x32xbf16>
    %c0_18 = arith.constant 0 : index
    %c0_19 = arith.constant 0 : index
    %48 = vector.load %arg6[%c0_18, %c0_19] : memref<32x32xbf16, #tpu.memory_space<vmem>>, vector<32x32xbf16>
    %cst_20 = arith.constant dense<0.000000e+00> : vector<16x32xf32>
    %49 = tpu.matmul %22, %48, %cst_20 {dimension_numbers = #tpu.dot_dimension_numbers<[1], [0], [0], [1], [0, 0, 1, 1], [], []>} : vector<16x32xbf16>, vector<32x32xbf16>, vector<16x32xf32> -> vector<16x32xf32>
    %c0_21 = arith.constant 0 : index
    %c0_22 = arith.constant 0 : index
    %50 = vector.load %arg7[%c0_21, %c0_22] : memref<1x32xf32, #tpu.memory_space<vmem>>, vector<1x32xf32>
    %51 = vector.broadcast %50 : vector<1x32xf32> to vector<16x32xf32>
    %52 = arith.addf %49, %51 : vector<16x32xf32>
    %c0_23 = arith.constant 0 : index
    %c0_24 = arith.constant 0 : index
    %53 = vector.load %arg8[%c0_23, %c0_24] : memref<32x64xbf16, #tpu.memory_space<vmem>>, vector<32x64xbf16>
    %cst_25 = arith.constant dense<0.000000e+00> : vector<8x64xf32>
    %54 = tpu.matmul %47, %53, %cst_25 {dimension_numbers = #tpu.dot_dimension_numbers<[1], [0], [0], [1], [0, 0, 1, 1], [], []>} : vector<8x32xbf16>, vector<32x64xbf16>, vector<8x64xf32> -> vector<8x64xf32>
    %c0_26 = arith.constant 0 : index
    %c0_27 = arith.constant 0 : index
    %55 = vector.load %arg9[%c0_26, %c0_27] : memref<1x64xf32, #tpu.memory_space<vmem>>, vector<1x64xf32>
    %56 = vector.broadcast %55 : vector<1x64xf32> to vector<8x64xf32>
    %57 = arith.addf %54, %56 : vector<8x64xf32>
    %58 = vector.extract_strided_slice %57 {offsets = [0, 0], sizes = [8, 32], strides = [1, 1]} : vector<8x64xf32> to vector<8x32xf32>
    %59 = vector.extract_strided_slice %57 {offsets = [0, 32], sizes = [8, 32], strides = [1, 1]} : vector<8x64xf32> to vector<8x32xf32>
    %c0_28 = arith.constant 0 : index
    %c0_29 = arith.constant 0 : index
    %c0_30 = arith.constant 0 : index
    %c0_31 = arith.constant 0 : index
    %60 = vector.load %arg3[%c0_28, %c0_29, %c0_30, %c0_31] : memref<1x1x16x8xbf16, #tpu.memory_space<vmem>>, vector<1x1x16x8xbf16>
    %61 = vector.shape_cast %60 : vector<1x1x16x8xbf16> to vector<1x16x8xbf16>
    %62 = arith.truncf %52 : vector<16x32xf32> to vector<16x32xbf16>
    %63 = vector.shape_cast %62 : vector<16x32xbf16> to vector<1x16x32xbf16>
    %64 = arith.truncf %58 : vector<8x32xf32> to vector<8x32xbf16>
    %65 = vector.shape_cast %64 : vector<8x32xbf16> to vector<1x8x32xbf16>
    %66 = arith.truncf %59 : vector<8x32xf32> to vector<8x32xbf16>
    %67 = vector.shape_cast %66 : vector<8x32xbf16> to vector<1x8x32xbf16>
    "tpu.trace_start"() <{level = 10 : i32, message = "bqd,bkd->bqk"}> : () -> ()
    %cst_32 = arith.constant dense<0.000000e+00> : vector<1x16x8xf32>
    %68 = tpu.matmul %63, %65, %cst_32 {dimension_numbers = #tpu.dot_dimension_numbers<[2], [2], [1], [1], [0, 0, 0, 1, 1, 1], [0], [0]>} : vector<1x16x32xbf16>, vector<1x8x32xbf16>, vector<1x16x8xf32> -> vector<1x16x8xf32>
    "tpu.trace_stop"() : () -> ()
    %cst_33 = arith.constant 0.176776692 : f32
    %69 = vector.broadcast %cst_33 : f32 to vector<1x16x8xf32>
    %70 = arith.mulf %68, %69 : vector<1x16x8xf32>
    %71 = arith.extf %61 : vector<1x16x8xbf16> to vector<1x16x8xf32>
    %72 = arith.addf %70, %71 : vector<1x16x8xf32>
    %cst_34 = arith.constant dense<0xFF800000> : vector<1x16xf32>
    %73 = vector.multi_reduction <maximumf>, %72, %cst_34 [2] : vector<1x16x8xf32> to vector<1x16xf32>
    %74 = vector.shape_cast %73 : vector<1x16xf32> to vector<1x16x1xf32>
    %75 = vector.broadcast %74 : vector<1x16x1xf32> to vector<1x16x8xf32>
    %76 = arith.subf %72, %75 : vector<1x16x8xf32>
    %77 = math.exp %76 : vector<1x16x8xf32>
    %cst_35 = arith.constant dense<0.000000e+00> : vector<1x16xf32>
    %78 = vector.multi_reduction <add>, %77, %cst_35 [2] : vector<1x16x8xf32> to vector<1x16xf32>
    %79 = vector.shape_cast %78 : vector<1x16xf32> to vector<1x16x1xf32>
    %80 = tpu.reciprocal %79 {approx = true} : vector<1x16x1xf32> -> vector<1x16x1xf32>
    %81 = vector.broadcast %80 : vector<1x16x1xf32> to vector<1x16x8xf32>
    %82 = arith.mulf %77, %81 : vector<1x16x8xf32>
    %83 = arith.truncf %82 : vector<1x16x8xf32> to vector<1x16x8xbf16>
    "tpu.trace_start"() <{level = 10 : i32, message = "bqk,bkd->bqd"}> : () -> ()
    %cst_36 = arith.constant dense<0.000000e+00> : vector<1x16x32xf32>
    %84 = tpu.matmul %83, %67, %cst_36 {dimension_numbers = #tpu.dot_dimension_numbers<[2], [1], [1], [2], [0, 0, 0, 1, 1, 2], [0], [0]>} : vector<1x16x8xbf16>, vector<1x8x32xbf16>, vector<1x16x32xf32> -> vector<1x16x32xf32>
    "tpu.trace_stop"() : () -> ()
    %85 = vector.shape_cast %84 : vector<1x16x32xf32> to vector<16x32xf32>
    %86 = arith.truncf %85 : vector<16x32xf32> to vector<16x32xbf16>
    %c0_37 = arith.constant 0 : index
    %c0_38 = arith.constant 0 : index
    %87 = vector.load %arg10[%c0_37, %c0_38] : memref<32x32xbf16, #tpu.memory_space<vmem>>, vector<32x32xbf16>
    %cst_39 = arith.constant dense<0.000000e+00> : vector<16x32xf32>
    %88 = tpu.matmul %86, %87, %cst_39 {dimension_numbers = #tpu.dot_dimension_numbers<[1], [0], [0], [1], [0, 0, 1, 1], [], []>} : vector<16x32xbf16>, vector<32x32xbf16>, vector<16x32xf32> -> vector<16x32xf32>
    %c0_40 = arith.constant 0 : index
    %c0_41 = arith.constant 0 : index
    %89 = vector.load %arg11[%c0_40, %c0_41] : memref<1x32xf32, #tpu.memory_space<vmem>>, vector<1x32xf32>
    %90 = vector.broadcast %89 : vector<1x32xf32> to vector<16x32xf32>
    %91 = arith.addf %88, %90 : vector<16x32xf32>
    %92 = arith.addf %1, %91 : vector<16x32xf32>
    %cst_42 = arith.constant dense<0.000000e+00> : vector<16xf32>
    %93 = vector.multi_reduction <add>, %92, %cst_42 [1] : vector<16x32xf32> to vector<16xf32>
    %94 = vector.shape_cast %93 : vector<16xf32> to vector<16x1xf32>
    %cst_43 = arith.constant 3.200000e+01 : f32
    %95 = vector.broadcast %cst_43 : f32 to vector<16x1xf32>
    %96 = arith.divf %94, %95 : vector<16x1xf32>
    %97 = vector.broadcast %96 : vector<16x1xf32> to vector<16x32xf32>
    %98 = arith.subf %92, %97 : vector<16x32xf32>
    %99 = arith.mulf %98, %98 : vector<16x32xf32>
    %cst_44 = arith.constant dense<0.000000e+00> : vector<16xf32>
    %100 = vector.multi_reduction <add>, %99, %cst_44 [1] : vector<16x32xf32> to vector<16xf32>
    %101 = vector.shape_cast %100 : vector<16xf32> to vector<16x1xf32>
    %cst_45 = arith.constant 3.200000e+01 : f32
    %102 = vector.broadcast %cst_45 : f32 to vector<16x1xf32>
    %103 = arith.divf %101, %102 : vector<16x1xf32>
    %104 = vector.broadcast %96 : vector<16x1xf32> to vector<16x32xf32>
    %105 = arith.subf %92, %104 : vector<16x32xf32>
    %cst_46 = arith.constant 9.99999997E-7 : f32
    %106 = vector.broadcast %cst_46 : f32 to vector<16x1xf32>
    %107 = arith.addf %103, %106 : vector<16x1xf32>
    %108 = math.rsqrt %107 : vector<16x1xf32>
    %109 = vector.broadcast %108 : vector<16x1xf32> to vector<16x32xf32>
    %110 = arith.mulf %105, %109 : vector<16x32xf32>
    %111 = arith.truncf %110 : vector<16x32xf32> to vector<16x32xbf16>
    %cst_47 = arith.constant 0.000000e+00 : f32
    %112 = vector.broadcast %cst_47 : f32 to vector<16x32xf32>
    %c0_48 = arith.constant 0 : index
    %c0_49 = arith.constant 0 : index
    %113 = vector.load %arg12[%c0_48, %c0_49] : memref<32x128xbf16, #tpu.memory_space<vmem>>, vector<32x128xbf16>
    %cst_50 = arith.constant dense<0.000000e+00> : vector<16x128xf32>
    %114 = tpu.matmul %111, %113, %cst_50 {dimension_numbers = #tpu.dot_dimension_numbers<[1], [0], [0], [1], [0, 0, 1, 1], [], []>} : vector<16x32xbf16>, vector<32x128xbf16>, vector<16x128xf32> -> vector<16x128xf32>
    %c0_51 = arith.constant 0 : index
    %c0_52 = arith.constant 0 : index
    %115 = vector.load %arg13[%c0_51, %c0_52] : memref<1x128xf32, #tpu.memory_space<vmem>>, vector<1x128xf32>
    %116 = vector.broadcast %115 : vector<1x128xf32> to vector<16x128xf32>
    %117 = arith.addf %114, %116 : vector<16x128xf32>
    %cst_53 = arith.constant 5.000000e-01 : f32
    %118 = vector.broadcast %cst_53 : f32 to vector<16x128xf32>
    %119 = arith.mulf %118, %117 : vector<16x128xf32>
    %cst_54 = arith.constant 4.471500e-02 : f32
    %120 = vector.broadcast %cst_54 : f32 to vector<16x128xf32>
    %121 = arith.mulf %120, %117 : vector<16x128xf32>
    %122 = arith.mulf %121, %117 : vector<16x128xf32>
    %123 = arith.mulf %122, %117 : vector<16x128xf32>
    %124 = arith.addf %117, %123 : vector<16x128xf32>
    %cst_55 = arith.constant 0.797884583 : f32
    %125 = vector.broadcast %cst_55 : f32 to vector<16x128xf32>
    %126 = arith.mulf %125, %124 : vector<16x128xf32>
    %127 = math.tanh %126 : vector<16x128xf32>
    %cst_56 = arith.constant 1.000000e+00 : f32
    %128 = vector.broadcast %cst_56 : f32 to vector<16x128xf32>
    %129 = arith.addf %128, %127 : vector<16x128xf32>
    %130 = arith.mulf %119, %129 : vector<16x128xf32>
    %131 = arith.truncf %130 : vector<16x128xf32> to vector<16x128xbf16>
    %c0_57 = arith.constant 0 : index
    %c0_58 = arith.constant 0 : index
    %132 = vector.load %arg14[%c0_57, %c0_58] : memref<128x32xbf16, #tpu.memory_space<vmem>>, vector<128x32xbf16>
    %cst_59 = arith.constant dense<0.000000e+00> : vector<16x32xf32>
    %133 = tpu.matmul %131, %132, %cst_59 {dimension_numbers = #tpu.dot_dimension_numbers<[1], [0], [0], [1], [0, 0, 1, 1], [], []>} : vector<16x128xbf16>, vector<128x32xbf16>, vector<16x32xf32> -> vector<16x32xf32>
    %134 = arith.addf %112, %133 : vector<16x32xf32>
    %c0_60 = arith.constant 0 : index
    %c0_61 = arith.constant 0 : index
    %135 = vector.load %arg15[%c0_60, %c0_61] : memref<1x32xf32, #tpu.memory_space<vmem>>, vector<1x32xf32>
    %136 = vector.broadcast %135 : vector<1x32xf32> to vector<16x32xf32>
    %137 = arith.addf %134, %136 : vector<16x32xf32>
    %138 = arith.addf %92, %137 : vector<16x32xf32>
    %139 = vector.shape_cast %138 : vector<16x32xf32> to vector<1x16x32xf32>
    %c0_62 = arith.constant 0 : index
    %c0_63 = arith.constant 0 : index
    %c0_64 = arith.constant 0 : index
    %140 = vector.load %arg16[%c0_62, %c0_63, %c0_64] : memref<1x16x32xf32, #tpu.memory_space<vmem>>, vector<1x16x32xf32>
    tpu.vector_store %arg16[%c0_62, %c0_63, %c0_64], %139 {strides = array<i32>} : memref<1x16x32xf32, #tpu.memory_space<vmem>>, vector<1x16x32xf32>,
    return
  }
  func.func @transform_0(%arg0: i32) -> (i32, i32, i32) {
    %c0_i32 = arith.constant 0 : i32
    %c0_i32_0 = arith.constant 0 : i32
    %c0_i32_1 = arith.constant 0 : i32
    return %arg0, %c0_i32, %c0_i32_0 : i32, i32, i32
  }
  func.func @transform_1(%arg0: i32) -> (i32, i32, i32) {
    %c0_i32 = arith.constant 0 : i32
    %c0_i32_0 = arith.constant 0 : i32
    %c0_i32_1 = arith.constant 0 : i32
    return %arg0, %c0_i32, %c0_i32_0 : i32, i32, i32
  }
  func.func @transform_2(%arg0: i32) -> (i32, i32, i32, i32) {
    %c0_i32 = arith.constant 0 : i32
    %c0_i32_0 = arith.constant 0 : i32
    %c0_i32_1 = arith.constant 0 : i32
    %c0_i32_2 = arith.constant 0 : i32
    return %arg0, %c0_i32, %c0_i32_0, %c0_i32_1 : i32, i32, i32, i32
  }
  func.func @transform_3(%arg0: i32) -> (i32, i32) {
    %c0_i32 = arith.constant 0 : i32
    %c0_i32_0 = arith.constant 0 : i32
    %c0_i32_1 = arith.constant 0 : i32
    return %c0_i32, %c0_i32_0 : i32, i32
  }
  func.func @transform_4(%arg0: i32) -> (i32, i32) {
    %c0_i32 = arith.constant 0 : i32
    %c0_i32_0 = arith.constant 0 : i32
    %c0_i32_1 = arith.constant 0 : i32
    return %c0_i32, %c0_i32_0 : i32, i32
  }
  func.func @transform_5(%arg0: i32) -> (i32, i32) {
    %c0_i32 = arith.constant 0 : i32
    %c0_i32_0 = arith.constant 0 : i32
    %c0_i32_1 = arith.constant 0 : i32
    return %c0_i32, %c0_i32_0 : i32, i32
  }
  func.func @transform_6(%arg0: i32) -> (i32, i32) {
    %c0_i32 = arith.constant 0 : i32
    %c0_i32_0 = arith.constant 0 : i32
    %c0_i32_1 = arith.constant 0 : i32
    return %c0_i32, %c0_i32_0 : i32, i32
  }
  func.func @transform_7(%arg0: i32) -> (i32, i32) {
    %c0_i32 = arith.constant 0 : i32
    %c0_i32_0 = arith.constant 0 : i32
    %c0_i32_1 = arith.constant 0 : i32
    return %c0_i32, %c0_i32_0 : i32, i32
  }
  func.func @transform_8(%arg0: i32) -> (i32, i32) {
    %c0_i32 = arith.constant 0 : i32
    %c0_i32_0 = arith.constant 0 : i32
    %c0_i32_1 = arith.constant 0 : i32
    return %c0_i32, %c0_i32_0 : i32, i32
  }
  func.func @transform_9(%arg0: i32) -> (i32, i32) {
    %c0_i32 = arith.constant 0 : i32
    %c0_i32_0 = arith.constant 0 : i32
    %c0_i32_1 = arith.constant 0 : i32
    return %c0_i32, %c0_i32_0 : i32, i32
  }
  func.func @transform_10(%arg0: i32) -> (i32, i32) {
    %c0_i32 = arith.constant 0 : i32
    %c0_i32_0 = arith.constant 0 : i32
    %c0_i32_1 = arith.constant 0 : i32
    return %c0_i32, %c0_i32_0 : i32, i32
  }
  func.func @transform_11(%arg0: i32) -> (i32, i32) {
    %c0_i32 = arith.constant 0 : i32
    %c0_i32_0 = arith.constant 0 : i32
    %c0_i32_1 = arith.constant 0 : i32
    return %c0_i32, %c0_i32_0 : i32, i32
  }
  func.func @transform_12(%arg0: i32) -> (i32, i32) {
    %c0_i32 = arith.constant 0 : i32
    %c0_i32_0 = arith.constant 0 : i32
    %c0_i32_1 = arith.constant 0 : i32
    return %c0_i32, %c0_i32_0 : i32, i32
  }
  func.func @transform_13(%arg0: i32) -> (i32, i32) {
    %c0_i32 = arith.constant 0 : i32
    %c0_i32_0 = arith.constant 0 : i32
    %c0_i32_1 = arith.constant 0 : i32
    return %c0_i32, %c0_i32_0 : i32, i32
  }
  func.func @transform_14(%arg0: i32) -> (i32, i32) {
    %c0_i32 = arith.constant 0 : i32
    %c0_i32_0 = arith.constant 0 : i32
    %c0_i32_1 = arith.constant 0 : i32
    return %c0_i32, %c0_i32_0 : i32, i32
  }
  func.func @transform_15(%arg0: i32) -> (i32, i32, i32) {
    %c0_i32 = arith.constant 0 : i32
    %c0_i32_0 = arith.constant 0 : i32
    %c0_i32_1 = arith.constant 0 : i32
    return %arg0, %c0_i32, %c0_i32_0 : i32, i32, i32
  }
}

</mosaic_0001>

<bundles_post_ra>
// kernel: tpu_custom_call.1
= control target key start
LH: loop header
LB: loop body
LE: loop exit
PB: predicated region body
PF: predicated region fallthrough
CT: control target
= control target key end

     0   :  { %20 = vsyncpa [#allocation3], 0  ;;  %s1993_s0 = inlined_call_operand.vmem [shape: f32[2,16,32], index: 0, kind: input, shape index: {}]   ;;  %s1994_s1 = inlined_call_operand.vmem [shape: f32[2,8,32], index: 1, kind: input, shape index: {}]   ;;  %s1995_s2 = inlined_call_operand.vmem [shape: bf16[2,1,16,8], index: 2, kind: input, shape index: {}]   ;;  %s1996_s3 = inlined_call_operand.vmem [shape: f32[1,32], index: 3, kind: input, shape index: {}]   ;;  %s1997_s4 = inlined_call_operand.vmem [shape: f32[1,32], index: 4, kind: input, shape index: {}]   ;;  %s1998_s5 = inlined_call_operand.vmem [shape: bf16[32,32], index: 5, kind: input, shape index: {}]   ;;  %s1999_s6 = inlined_call_operand.hbm [shape: f32[1,32], index: 6, kind: input, shape index: {}]   ;;  %s2000_s7 = inlined_call_operand.vmem [shape: bf16[32,64], index: 7, kind: input, shape index: {}]   ;;  %s2001_s8 = inlined_call_operand.vmem [shape: f32[1,64], index: 8, kind: input, shape index: {}]   ;;  %s2002_s9 = inlined_call_operand.vmem [shape: bf16[32,32], index: 9, kind: input, shape index: {}]   ;;  %s2003_s10 = inlined_call_operand.vmem [shape: f32[1,32], index: 10, kind: input, shape index: {}]   ;;  %s2004_s11 = inlined_call_operand.vmem [shape: bf16[32,128], index: 11, kind: input, shape index: {}]   ;;  %s2005_s12 = inlined_call_operand.vmem [shape: f32[1,128], index: 12, kind: input, shape index: {}]   ;;  %s2006_s13 = inlined_call_operand.vmem [shape: bf16[128,32], index: 13, kind: input, shape index: {}]   ;;  %s2007_s14 = inlined_call_operand.vmem [shape: f32[1,32], index: 14, kind: input, shape index: {}]   ;;  %s2008_s15 = inlined_call_operand.hbm [shape: f32[2,16,32], index: 15, kind: output, shape index: {}]  }
   0x1   :  { %21 = vsyncpa [#allocation4], 0 }
   0x2   :  { %23 = vsyncpa [#allocation4 + $0x1], 0  ;;  %s1700_s18 = smov 0   ;;  %s1702_s19 = smov 0  }
   0x3   :  { %s1704_s20 = smov 0   ;;  %s1706_s21 = smov 0  }
   0x4 LB: > { %2017 = sst [smem:[#allocation8_spill]] %s1599_s18  ;;  %s1721_s22 = sadd.s32 4294967295, %s1611_s21   ;;  %s1611_s21 = sphi %s1706_s21, %s2033_s21   ;;  %s1607_s20 = sphi %s1704_s20, %s2038_s20   ;;  %s1603_s19 = sphi %s1702_s19, %s2037_s19   ;;  %s1599_s18 = sphi %s1700_s18, %s2036_s18  }
   0x5   : > { %2018 = sst [smem:[#allocation9_spill]] %s1607_s20  ;;  %s1282_s23 = sadd.s32 4294967294, %s1611_s21  }
   0x6   : > { %s1725_s24 = sadd.s32 1, %s1611_s21   ;;  %s366_s25 = sadd.s32 1, %s1607_s20 }
   0x7   : > { %2019 = sst [smem:[#allocation10_spill]] %s1725_s24  ;;  %s363_s26 = ssub.s32 %s1611_s21, %s1725_s24 }
   0x8   : > { %p376_p0 = scmp.ne.s32.totalorder %s1607_s20, %s1603_s19  ;;  %p364_p1 = scmp.eq.s32.totalorder %s363_s26, 0 }
   0x9   : > { %p377_p2 = scmp.eq.s32.totalorder %s1721_s22, 1  ;;  %p382_p3 = scmp.ne.s32.totalorder %s1603_s19, %s1599_s18 }
   0xa   : > { %p383_p4 = scmp.eq.s32.totalorder %s1282_s23, 1  ;;  %p1283_p7 = scmp.ge.s32.totalorder %s1611_s21, 1 }
   0xb   : > { %s1736_s27 = scalar_select %p364_p1, %s1607_s20, %s366_s25  }
   0xc   : > { %p1738_p5 = por %p377_p2, %p376_p0  ;;  %p1742_p6 = por %p383_p4, %p382_p3 }
   0xd   : > { %2020 = sst [smem:[#allocation11_spill]] %s1736_s27  ;;  %p390_p8 = scmp.lt.s32.totalorder %s1611_s21, 3 }
   0xe   : > { %s2021_s28 = scalar_select %p1738_p5, 1, 0 }
   0xf   : > { %s2022_s29 = scalar_select %p1742_p6, 1, 0 }
  0x10   : > { %p2014_p9 = scmp.eq.s32.totalorder %s1721_s22, 0  ;;  %p1749_p10 = pnand %p1283_p7, %p390_p8 }
  0x11   : > { %2023 = sst [smem:[#allocation12_spill]] %s2022_s29  ;;  %s1613_s16 = smov [#allocation2]  }
  0x12   : > { %s2024_s30 = scalar_select %p1749_p10, 1, 0 }
  0x13   : > { %s412_s17 = sshll.u32 %s1613_s16, 4  ;;  %p1430_p11 = pneg %p1749_p10  ;;  %s413_s17 = int_to_ptr.vmem [resolvable:$true] %s412_s17 }
  0x14   : > { %s1517_s27 = scalar_lea.hbm %s1999_s6, 16 }
  0x15   : > { %p1757_p12 = pnand %p2014_p9, %p1430_p11  ;;  %p1518_p13 = scmp.ne.s32.totalorder %s1999_s6, %s1517_s27 }
  0x16   : > { %p1524_p3 = scmp.lt.u32.totalorder %s1517_s27, %s1999_s6 }
  0x17   : > { %p1519_p0 = pneg %p1757_p12 }
  0x19   : > { %p1520_p1 = pnand %p1519_p0, %p1518_p13 }
  0x1b   : > { %p1521_p2 = pneg %p1520_p1 }
  0x1d   : > { %p1526_p4 = pnand %p1524_p3, %p1521_p2 }
  0x1f   : > { %1529 = shalt.err (!%p1526_p4)
}
  0x20   : > { %s1530_s18 = scalar_lea.vmem %s413_s17, 16  ;;  %s1537_s25 = scalar_lea.vmem %s413_s17, 32 }
  0x21   : > { %p1531_p7 = scmp.ne.s32.totalorder %s413_s17, %s1530_s18  ;;  %p1538_p9 = scmp.lt.s32.totalorder %s413_s17, %s413_s17 }
  0x22   : > { %p1539_p6 = scmp.lt.s32.totalorder %s1537_s25, %s1530_s18 }
  0x23   : > { %p1533_p8 = pnand %p1531_p7, %p1519_p0 }
  0x24   : > { %p1540_p5 = por %p1539_p6, %p1538_p9 }
  0x25   : > { %p1534_p11 = pneg %p1533_p8 }
  0x27   : > { %p1541_p10 = pnand %p1540_p5, %p1534_p11 }
  0x29   : > { %1544 = shalt.err (!%p1541_p10)
}
  0x2a   : > { %1433 = dma.hbm_to_vmem [thread:$0]  (!%p1757_p12), %s1999_s6, 16, %s413_s17, [#allocation3]  }
  0x2b   : > { %p2026_p13 = scmp.ne.s32.totalorder %s2024_s30, 0 }
  0x2c   : > { %p2027_p1 = scmp.eq.s32.totalorder (!%p2026_p13), %s1721_s22, 0 }
  0x2d   : > { %472 = sbr.rel (%p2026_p13) target bundleno = 2365 (0x93d), region = 80 }
  0x34   : > { %1590 = dma.done.wait (%p2027_p1), [#allocation3], 16   ;;  %p2028_p0 = pmov %p2027_p1 }
  0x35   : > { %p529_p6 = scmp.lt.s32.totalorder %s1721_s22, 1  ;;  %vm547_vm0 = vcmask 261120   ;;  %v1479_v21 = vld [vmem:[%s1998_s5] sm:$0xff]   ;;  %v1614_v22 = vmov 0.0   ;;  %v1480_v23 = vld [vmem:[%s1998_s5 + $0x8] sm:$0xff]   ;;  %vm1615_vm1 = vmmov 0  }
  0x36   : > { %1592 = vsyncadd (%p2028_p0), [#allocation3], 4294967280  ;;  %1360 = vmatprep.subr.bf16.mxu1 %v1614_v22  ;;  %1388 = vmatprep.subr.bf16.mxu0 %v1614_v22  ;;  %v1294_v37 = vld [vmem:[%s1996_s3] ss:$0 sm:$0xff]  ;;  %v1482_v44 = vld [vmem:[%s2000_s7 + $0x8] sm:$0xff]   ;;  %vm796_vm2 = vcmask 64512  }
  0x37   : > { %s1785_s18 = scalar_select %p529_p6, %s1721_s22, 1  ;;  %1361 = vmatpush3.bf16.msra.mxu1 %v1479_v21  ;;  %1364 = vmatprep.mubr.msk.bf16.mxu1 %vm1615_vm1, %v1614_v22  ;;  %v1481_v40 = vld [vmem:[%s2000_s7] sm:$0xff]   ;;  %vm826_vm3 = vcmask 1043456  }
  0x38   : > { %1362 = vmatprep.subr.bf16.mxu1 %v1614_v22  ;;  %1392 = vmatprep.mubr.msk.bf16.mxu0 %vm1615_vm1, %v1614_v22  ;;  %v1295_v43 = vld [vmem:[%s1997_s4] ss:$0 sm:$0xff]  ;;  %s526_s23 = sand.u32 1, %s1603_s19   ;;  %p2029_p9 = scmp.ne.s32.totalorder %s2021_s28, 0 }
  0x39   : > { %s1328_s27 = sshll.u32 %s1785_s18, 4  ;;  %s1291_s29 = sshll.u32 %s1785_s18, 3  ;;  %v1296_v47 = vld [vmem:[#allocation2] ss:$0 sm:$0xff] }
  0x3a   : > { %s533_s30 = scalar_lea.vmem %s1993_s0, %s1328_s27  ;;  %s537_s25 = scalar_lea.vmem %s1994_s1, %s1291_s29  ;;  %v1300_v55 = vld [vmem:[%s2001_s8] ss:$0 sm:$0xff] }
  0x3b   : > { %v1797_v0 = vld [vmem:[%s533_s30] sm:$0xff]  ;;  %v1802_v4 = vld [vmem:[%s533_s30 + $0x8] sm:$0xff]  ;;  %1363 = vmatpush3.bf16.msra.mxu1 %v1480_v23  ;;  %s542_s16 = scalar_lea.vmem %s1995_s2, %s1291_s29  ;;  %s1616_s18 = smov 96  }
  0x3c   : > { %v546_v1 = vld [vmem:[%s537_s25] sm:$0xff]  ;;  %v548_v2 = vsel %vm547_vm0, %v1797_v0, 0.0  ;;  %v551_v5 = vsel %vm547_vm0, %v1802_v4, 0.0  ;;  %1368 = vmatprep.subr.bf16.mxu1 %v1614_v22  ;;  %s1288_s30 = sshll.u32 %s526_s23, 4 }
  0x3d   : > { %v576_v3 = vsel %vm547_vm0, %v546_v1, 0.0  ;;  %549 = vadd.xlane.f32.xlu0 %v548_v2  ;;  %v1332_v63 = vld [vmem:[%s542_s16] sm:$0xff]   ;;  %s528_s29 = scalar_lea.vmem [#allocation5], %s1288_s30  ;;  %s1617_s30 = smov [#allocation5]  }
  0x3e   : > { %577 = vadd.xlane.f32.xlu1 %v576_v3  ;;  %s1184_s25 = sshll.u32 %s528_s29, 4  ;;  %s1549_s26 = sshll.u32 %s1617_s30, 4  ;;  %s1947_s25 = int_to_ptr.vmem [resolvable:$true] %s1184_s25  ;;  %s1550_s26 = int_to_ptr.vmem [resolvable:$false] %s1549_s26 }
  0x3f   : > { %s1545_s17 = scalar_lea.vmem %s1947_s25, 256  ;;  %s1551_s16 = scalar_lea.vmem %s1550_s26, 512 }
  0x40   : > { %p1546_p5 = scmp.ne.s32.totalorder %s1947_s25, %s1545_s17  ;;  %p1552_p2 = scmp.lt.s32.totalorder %s1947_s25, %s1550_s26 }
  0x41   : > { %552 = vadd.xlane.f32.xlu0 %v551_v5  ;;  %p1553_p3 = scmp.lt.s32.totalorder %s1551_s16, %s1545_s17 }
  0x42   : > { %p1547_p10 = pnand %p1546_p5, %p2029_p9 }
  0x43   : > { %p1554_p4 = por %p1553_p3, %p1552_p2 }
  0x44   : > { %p1548_p12 = pneg %p1547_p10 }
  0x46   : > { %p1555_p7 = pnand %p1554_p4, %p1548_p12 }
  0xca   : > { %v550_v6 = vpop.xlane.xlu0 %549 }
  0xcb   : > { %v578_v7 = vpop.xlane.xlu1 %577  ;;  %v555_v8 = vmul.f32 0.03125, %v550_v6  ;;  %v1334_v6 = vunpack.c.h.bf16 %v1332_v63 }
  0xcc   : > { %v579_v9 = vmul.f32 0.03125, %v578_v7 }
  0xcd   : > { %v557_v10 = vsub.f32 %v1797_v0, %v555_v8 }
  0xce   : > { %v580_v11 = vsub.f32 %v546_v1, %v579_v9  ;;  %v553_v12 = vpop.xlane.xlu0 %552  ;;  %v1333_v1 = vunpack.c.l.bf16 %v1332_v63 }
  0xcf   : > { %v556_v13 = vmul.f32 0.03125, %v553_v12  ;;  %v559_v14 = vmul.f32 %v557_v10, %v557_v10 }
  0xd0   : > { %v581_v15 = vmul.f32 %v580_v11, %v580_v11 }
  0xd1   : > { %v558_v16 = vsub.f32 %v1802_v4, %v556_v13  ;;  %v561_v17 = vsel %vm547_vm0, %v559_v14, 0.0 }
  0xd2   : > { %562 = vadd.xlane.f32.xlu1 %v561_v17  ;;  %v582_v18 = vsel %vm547_vm0, %v581_v15, 0.0 }
  0xd3   : > { %v560_v19 = vmul.f32 %v558_v16, %v558_v16 }
  0xd5   : > { %v564_v20 = vsel %vm547_vm0, %v560_v19, 0.0 }
  0xd6   : > { %583 = vadd.xlane.f32.xlu1 %v582_v18  ;;  %565 = vadd.xlane.f32.xlu0 %v564_v20 }
 0x15f   : > { %v563_v24 = vpop.xlane.xlu1 %562 }
 0x160   : > { %v567_v25 = vmul.f32 0.03125, %v563_v24 }
 0x162   : > { %v569_v26 = vadd.f32 1e-06, %v567_v25  ;;  %v1483_v25 = vld [vmem:[%s2002_s9] sm:$0xff]  }
 0x163   : > { %v584_v27 = vpop.xlane.xlu1 %583  ;;  %v566_v28 = vpop.xlane.xlu0 %565  ;;  %1389 = vmatpush3.bf16.msra.mxu0 %v1483_v25 }
 0x164   : > { %v585_v29 = vmul.f32 0.03125, %v584_v27  ;;  %v568_v30 = vmul.f32 0.03125, %v566_v28  ;;  %1495 = vrsqrt.f32 %v569_v26  ;;  %1390 = vmatprep.subr.bf16.mxu0 %v1614_v22 }
 0x166   : > { %v586_v31 = vadd.f32 1e-05, %v585_v29  ;;  %v570_v32 = vadd.f32 1e-06, %v568_v30 }
 0x168   : > { %1497 = vrsqrt.f32 %v586_v31 }
 0x169   : > { %1499 = vrsqrt.f32 %v570_v32 }
 0x16e   : > { %v1496_v33 = vpop.eup %1495 }
 0x16f   : > { %v573_v38 = vmul.f32 %v1496_v33, %v557_v10 }
 0x172   : > { %v1498_v34 = vpop.eup %1497 }
 0x173   : > { %v1500_v35 = vpop.eup %1499  ;;  %v588_v36 = vmul.f32 %v1498_v34, %v580_v11 }
 0x174   : > { %v574_v39 = vmul.f32 %v1500_v35, %v558_v16  ;;  %v1484_v35 = vld [vmem:[%s2002_s9 + $0x8] sm:$0xff]  }
 0x175   : > { %v596_v42 = vmul.f32 %v1294_v37, %v588_v36  ;;  %1391 = vmatpush3.bf16.msra.mxu0 %v1484_v35 }
 0x176   : > { %v575_v41 = vpack.c.bf16 %v574_v39, %v573_v38  ;;  %1404 = vmatprep.subr.bf16.mxu0 %v1614_v22 }
 0x177   : > { %v604_v45 = vadd.f32 %v1295_v43, %v596_v42 }
 0x178   : > { %1365 = vmatmul.mubr.msk.bf16.vlgmr.msra.gmra.mrb[0].mxu1 %vm547_vm0, %v575_v41  ;;  %v1306_v41 = vld [vmem:[%s2003_s10] ss:$0 sm:$0xff] }
 0x179   : > { %1369 = vmatpush3.bf16.msra.mxu1 %v1481_v40  ;;  %1372 = vmatprep.mubr.msk.bf16.mxu1 %vm1615_vm1, %v1614_v22  ;;  %v605_v46 = vpack.c.bf16 %v604_v45, %v604_v45 }
 0x17a   : > { %1370 = vmatprep.subr.bf16.mxu1 %v1614_v22 }
 0x17d   : > { %1371 = vmatpush3.bf16.msra.mxu1 %v1482_v44 }
 0x17e   : > { %1376 = vmatprep.subr.bf16.mxu1 %v1614_v22 }
 0x180   : > { %1373 = vmatmul.mubr.msk.bf16.vlgmr.msra.gmra.mrb[4].mxu1 %vm547_vm0, %v605_v46 }
 0x181   : > { %1378 = vmatprep.mubr.msk.bf16.mxu1 %vm1615_vm1, %v1614_v22 }
 0x24b   : > { %v666_v48 = vpop.f32.mrb[0].mxu1 }
 0x24c   : > { %v1366_v49 = vpop.f32.mrb[1].mxu1  ;;  %v667_v51 = vadd.f32 %v1296_v47, %v666_v48 }
 0x24d   : > { %v669_v50 = vpop.f32.mrb[2].mxu1 }
 0x24e   : > { %v670_v52 = vadd.f32 %v1296_v47, %v669_v50  ;;  %v1367_v53 = vpop.f32.mrb[3].mxu1 }
 0x250   : > { %v741_v54 = vpack.c.bf16 %v670_v52, %v667_v51 }
 0x253   : > { %v733_v56 = vpop.f32.mrb[4].mxu1 }
 0x254   : > { %v734_v57 = vadd.f32 %v1300_v55, %v733_v56  ;;  %v1374_v58 = vpop.f32.mrb[5].mxu1 }
 0x255   : > { %v736_v59 = vpop.f32.mrb[6].mxu1 }
 0x256   : > { %v742_v60 = vpack.c.bf16 %v734_v57, %v734_v57  ;;  %v1375_v61 = vpop.f32.mrb[7].mxu1 }
 0x257   : > { %v1486_v61 = vld [vmem:[%s2004_s11 + $0x8] sm:$0xff]  }
 0x258   : > { %v747_v62 = vsel %vm547_vm0, %v742_v60, 0 }
 0x259   : > { %1377 = vmatpush3.bf16.xpose.msra.mxu1 %v747_v62 }
 0x25a   : > { %1382 = vmatprep.subr.bf16.mxu1 %v1614_v22 }
 0x260   : > { %1379 = vmatmul.mubr.msk.bf16.vlgmr.msra.gmra.mrb[8].mxu1 %vm547_vm0, %v741_v54 }
 0x261   : > { %1384 = vmatprep.mubr.msk.bf16.mxu1 %vm1615_vm1, %v1614_v22 }
 0x333   : > { %v783_v2 = vpop.f32.mrb[8].mxu1 }
 0x334   : > { %v790_v3 = vmul.f32 0.17677669, %v783_v2  ;;  %v1380_v5 = vpop.f32.mrb[9].mxu1 }
 0x335   : > { %v786_v7 = vpop.f32.mrb[10].mxu1 }
 0x336   : > { %v791_v8 = vmul.f32 0.17677669, %v786_v7  ;;  %v1381_v9 = vpop.f32.mrb[11].mxu1  ;;  %v794_v10 = vadd.f32 %v1333_v1, %v790_v3 }
 0x338   : > { %v797_v11 = vsel %vm796_vm2, %v794_v10, -inf  ;;  %v795_v12 = vadd.f32 %v1334_v6, %v791_v8 }
 0x339   : > { %798 = vmax.xlane.f32.xlu0 %v797_v11  ;;  %v1487_v11 = vld [vmem:[%s2006_s13] sm:$0xff]  }
 0x33a   : > { %v800_v13 = vsel %vm796_vm2, %v795_v12, -inf }
 0x33b   : > { %801 = vmax.xlane.f32.xlu1 %v800_v13  ;;  %v1489_v13 = vld [vmem:[%s2006_s13 + $0x10] sm:$0xff]  }
 0x3c6   : > { %v799_v14 = vpop.xlane.xlu0 %798 }
 0x3c7   : > { %v803_v15 = vsub.f32 %v794_v10, %v799_v14  ;;  %v1490_v14 = vld [vmem:[%s2006_s13 + $0x18] sm:$0xff]  }
 0x3c8   : > { %v802_v16 = vpop.xlane.xlu1 %801 }
 0x3c9   : > { %v805_v17 = vmul.f32 1.442695, %v803_v15  ;;  %v804_v18 = vsub.f32 %v795_v12, %v802_v16  ;;  %v1488_v12 = vld [vmem:[%s2006_s13 + $0x8] sm:$0xff]   ;;  %v1491_v15 = vld [vmem:[%s2006_s13 + $0x20] sm:$0xff]  }
 0x3ca   : > { %v1492_v16 = vld [vmem:[%s2006_s13 + $0x28] sm:$0xff]  }
 0x3cb   : > { %1501 = vpow2.f32 %v805_v17  ;;  %v807_v19 = vmul.f32 1.442695, %v804_v18  ;;  %v1493_v17 = vld [vmem:[%s2006_s13 + $0x30] sm:$0xff]   ;;  %v1494_v18 = vld [vmem:[%s2006_s13 + $0x38] sm:$0xff]  }
 0x3cd   : > { %1503 = vpow2.f32 %v807_v19  ;;  %v1310_v19 = vld [vmem:[%s2005_s12] ss:$0 sm:$0xff] }
 0x3d5   : > { %v1502_v20 = vpop.eup %1501 }
 0x3d6   : > { %v809_v21 = vsel %vm796_vm2, %v1502_v20, 0.0 }
 0x3d7   : > { %v1504_v23 = vpop.eup %1503  ;;  %810 = vadd.xlane.f32.xlu0 %v809_v21 }
 0x3d8   : > { %v812_v24 = vsel %vm796_vm2, %v1504_v23, 0.0 }
 0x3d9   : > { %813 = vadd.xlane.f32.xlu1 %v812_v24 }
 0x3ed   : > { %821 = vrot.lane.b32.xlu0 %v742_v60, %s1616_s18  ;;  %v1485_v60 = vld [vmem:[%s2004_s11] sm:$0xff]   ;;  %s1330_s18 = sshll.u32 %s1721_s22, 8  ;;  %s1952_s22 = scalar_lea.sflag [#allocation4], %s526_s23 }
 0x3ee   : > { %s1945_s27 = scalar_lea.hbm %s2008_s15, %s1330_s18 }
 0x464   : > { %v811_v26 = vpop.xlane.xlu0 %810 }
 0x465   : > { %1505 = vrcp.f32 %v811_v26 }
 0x466   : > { %v814_v27 = vpop.xlane.xlu1 %813 }
 0x467   : > { %1507 = vrcp.f32 %v814_v27 }
 0x468   : > { %v822_v28 = vpop.permute.xlu0 %821 }
 0x469   : > { %v828_v29 = vsel %vm826_vm3, %v822_v28, 0 }
 0x46a   : > { %1383 = vmatpush3.bf16.msra.mxu1 %v828_v29 }
 0x46b   : > { %1396 = vmatprep.subr.bf16.mxu1 %v1614_v22 }
 0x46f   : > { %v1506_v30 = vpop.eup %1505 }
 0x470   : > { %v817_v32 = vmul.f32 %v1506_v30, %v1502_v20 }
 0x471   : > { %v1508_v31 = vpop.eup %1507 }
 0x472   : > { %v818_v33 = vmul.f32 %v1508_v31, %v1504_v23 }
 0x474   : > { %v819_v34 = vpack.c.bf16 %v818_v33, %v817_v32 }
 0x476   : > { %1385 = vmatmul.mubr.msk.bf16.vlgmr.msra.gmra.mrb[12].mxu1 %vm796_vm2, %v819_v34 }
 0x477   : > { %1400 = vmatprep.mubr.msk.bf16.mxu1 %vm1615_vm1, %v1614_v22  ;;  %1397 = vmatpush3.bf16.msra.mxu1 %v1485_v60 }
 0x478   : > { %1398 = vmatprep.subr.bf16.mxu1 %v1614_v22 }
 0x47b   : > { %1399 = vmatpush3.bf16.msra.mxu1 %v1486_v61 }
 0x549   : > { %v864_v36 = vpop.f32.mrb[12].mxu1 }
 0x54a   : > { %v1386_v37 = vpop.f32.mrb[13].mxu1 }
 0x54b   : > { %v867_v38 = vpop.f32.mrb[14].mxu1 }
 0x54c   : > { %v871_v39 = vpack.c.bf16 %v867_v38, %v864_v36  ;;  %v1387_v40 = vpop.f32.mrb[15].mxu1 }
 0x54e   : > { %1393 = vmatmul.mubr.msk.bf16.vlgmr.msra.gmra.mrb[0].mxu0 %vm547_vm0, %v871_v39 }
 0x54f   : > { %1420 = vmatprep.mubr.msk.bf16.mxu0 %vm1615_vm1, %v1614_v22  ;;  %1405 = vmatpush3.bf16.msra.mxu0 %v1487_v11 }
 0x550   : > { %1406 = vmatprep.subr.bf16.mxu0 %v1614_v22 }
 0x553   : > { %1407 = vmatpush3.bf16.msra.mxu0 %v1488_v12 }
 0x554   : > { %1408 = vmatprep.subr.bf16.mxu0 %v1614_v22 }
 0x557   : > { %1409 = vmatpush3.bf16.msra.mxu0 %v1489_v13 }
 0x558   : > { %1410 = vmatprep.subr.bf16.mxu0 %v1614_v22 }
 0x55b   : > { %1411 = vmatpush3.bf16.msra.mxu0 %v1490_v14 }
 0x55c   : > { %1412 = vmatprep.subr.bf16.mxu0 %v1614_v22 }
 0x55f   : > { %1413 = vmatpush3.bf16.msra.mxu0 %v1491_v15 }
 0x560   : > { %1414 = vmatprep.subr.bf16.mxu0 %v1614_v22 }
 0x563   : > { %1415 = vmatpush3.bf16.msra.mxu0 %v1492_v16 }
 0x564   : > { %1416 = vmatprep.subr.bf16.mxu0 %v1614_v22 }
 0x567   : > { %1417 = vmatpush3.bf16.msra.mxu0 %v1493_v17 }
 0x568   : > { %1418 = vmatprep.subr.bf16.mxu0 %v1614_v22 }
 0x56b   : > { %1419 = vmatpush3.bf16.msra.mxu0 %v1494_v18 }
 0x621   : > { %v932_v42 = vpop.f32.mrb[0].mxu0 }
 0x622   : > { %v933_v43 = vadd.f32 %v1306_v41, %v932_v42  ;;  %v1394_v44 = vpop.f32.mrb[1].mxu0 }
 0x623   : > { %v935_v45 = vpop.f32.mrb[2].mxu0 }
 0x624   : > { %v1881_v46 = vadd.f32 %v933_v43, %v1797_v0  ;;  %v936_v47 = vadd.f32 %v1306_v41, %v935_v45  ;;  %v1395_v48 = vpop.f32.mrb[3].mxu0  ;;  %v1314_v45 = vld [vmem:[%s2007_s14] ss:$0 sm:$0xff] }
 0x626   : > { %v1884_v49 = vadd.f32 %v936_v47, %v1802_v4  ;;  %v941_v50 = vsel %vm547_vm0, %v1881_v46, 0.0 }
 0x627   : > { %942 = vadd.xlane.f32.xlu1 %v941_v50 }
 0x628   : > { %v944_v51 = vsel %vm547_vm0, %v1884_v49, 0.0 }
 0x62b   : > { %945 = vadd.xlane.f32.xlu1 %v944_v51 }
 0x6b4   : > { %v943_v52 = vpop.xlane.xlu1 %942 }
 0x6b5   : > { %v947_v53 = vmul.f32 0.03125, %v943_v52 }
 0x6b7   : > { %v949_v54 = vsub.f32 %v1881_v46, %v947_v53 }
 0x6b8   : > { %v946_v55 = vpop.xlane.xlu1 %945 }
 0x6b9   : > { %v948_v0 = vmul.f32 0.03125, %v946_v55  ;;  %v951_v56 = vmul.f32 %v949_v54, %v949_v54 }
 0x6bb   : > { %v950_v57 = vsub.f32 %v1884_v49, %v948_v0  ;;  %v953_v4 = vsel %vm547_vm0, %v951_v56, 0.0 }
 0x6bc   : > { %954 = vadd.xlane.f32.xlu1 %v953_v4 }
 0x6bd   : > { %v952_v58 = vmul.f32 %v950_v57, %v950_v57 }
 0x6bf   : > { %v956_v59 = vsel %vm547_vm0, %v952_v58, 0.0 }
 0x6c0   : > { %957 = vadd.xlane.f32.xlu1 %v956_v59 }
 0x749   : > { %v955_v62 = vpop.xlane.xlu1 %954 }
 0x74a   : > { %v959_v63 = vmul.f32 0.03125, %v955_v62 }
 0x74c   : > { %v961_v1 = vadd.f32 1e-06, %v959_v63 }
 0x74d   : > { %v958_v2 = vpop.xlane.xlu1 %957 }
 0x74e   : > { %v960_v3 = vmul.f32 0.03125, %v958_v2  ;;  %1509 = vrsqrt.f32 %v961_v1 }
 0x750   : > { %v962_v5 = vadd.f32 1e-06, %v960_v3 }
 0x752   : > { %1511 = vrsqrt.f32 %v962_v5 }
 0x758   : > { %v1510_v6 = vpop.eup %1509 }
 0x759   : > { %v965_v8 = vmul.f32 %v1510_v6, %v949_v54 }
 0x75c   : > { %v1512_v7 = vpop.eup %1511 }
 0x75d   : > { %v966_v9 = vmul.f32 %v1512_v7, %v950_v57 }
 0x75f   : > { %v967_v10 = vpack.c.bf16 %v966_v9, %v965_v8 }
 0x761   : > { %1401 = vmatmul.mubr.msk.bf16.vlgmr.msra.gmra.mrb[16].mxu1 %vm547_vm0, %v967_v10 }
 0x834   : > { %v1028_v20 = vpop.f32.mrb[16].mxu1 }
 0x835   : > { %v1029_v21 = vadd.f32 %v1310_v19, %v1028_v20  ;;  %v1402_v23 = vpop.f32.mrb[17].mxu1 }
 0x836   : > { %v1031_v24 = vpop.f32.mrb[18].mxu1 }
 0x837   : > { %v1037_v25 = vmul.f32 0.044715, %v1029_v21  ;;  %v1032_v26 = vadd.f32 %v1310_v19, %v1031_v24  ;;  %v1403_v27 = vpop.f32.mrb[19].mxu1  ;;  %v1035_v39 = vmul.f32 0.5, %v1029_v21 }
 0x839   : > { %v1039_v28 = vmul.f32 %v1037_v25, %v1029_v21  ;;  %v1038_v29 = vmul.f32 0.044715, %v1032_v26  ;;  %v1036_v40 = vmul.f32 0.5, %v1032_v26 }
 0x83b   : > { %v1041_v30 = vmul.f32 %v1039_v28, %v1029_v21  ;;  %v1040_v31 = vmul.f32 %v1038_v29, %v1032_v26 }
 0x83d   : > { %v1043_v32 = vadd.f32 %v1041_v30, %v1029_v21  ;;  %v1042_v33 = vmul.f32 %v1040_v31, %v1032_v26 }
 0x83f   : > { %v1045_v22 = vmul.f32 0.7978846, %v1043_v32  ;;  %v1044_v34 = vadd.f32 %v1042_v33, %v1032_v26 }
 0x841   : > { %1513 = vtanh.f32 %v1045_v22  ;;  %v1046_v35 = vmul.f32 0.7978846, %v1044_v34 }
 0x843   : > { %1515 = vtanh.f32 %v1046_v35 }
 0x84b   : > { %v1514_v36 = vpop.eup %1513 }
 0x84c   : > { %v1049_v37 = vadd.f32 1.0, %v1514_v36 }
 0x84d   : > { %v1516_v38 = vpop.eup %1515 }
 0x84e   : > { %v1050_v41 = vadd.f32 1.0, %v1516_v38  ;;  %v1051_v42 = vmul.f32 %v1049_v37, %v1035_v39 }
 0x850   : > { %v1052_v43 = vmul.f32 %v1050_v41, %v1036_v40 }
 0x852   : > { %v1053_v44 = vpack.c.bf16 %v1052_v43, %v1051_v42 }
 0x854   : > { %1421 = vmatmul.mubr.bf16.vlgmr.msra.gmra.mrb[4].mxu0 %v1053_v44 }
 0x927   : > { %v1159_v47 = vpop.f32.mrb[4].mxu0 }
 0x928   : > { %v1160_v48 = vadd.f32 %v1314_v45, %v1159_v47  ;;  %v1422_v50 = vpop.f32.mrb[5].mxu0 }
 0x929   : > { %v1162_v51 = vpop.f32.mrb[6].mxu0 }
 0x92a   : > { %v1166_v52 = vadd.f32 %v1160_v48, %v1881_v46  ;;  %v1163_v53 = vadd.f32 %v1314_v45, %v1162_v51  ;;  %v1423_v54 = vpop.f32.mrb[7].mxu0 }
 0x92c   : > { %1168 = vst.msk [vmem:[%s528_s29] sm:$0xff] %vm547_vm0, %v1166_v52  ;;  %v1167_v55 = vadd.f32 %v1163_v53, %v1884_v49 }
 0x92e   : > { %1169 = vst.msk [vmem:[%s528_s29 + $0x8] sm:$0xff] %vm547_vm0, %v1167_v55 }
 0x92f   : > { %1558 = shalt.err (!%p1555_p7)
}
 0x930   : > { %s1559_s23 = scalar_lea.hbm %s1945_s27, 256  ;;  %s1563_s20 = scalar_lea.hbm %s2008_s15, 512 }
 0x931   : > { %p1560_p8 = scmp.ne.s32.totalorder %s1945_s27, %s1559_s23  ;;  %p1564_p1 = scmp.lt.u32.totalorder %s1945_s27, %s2008_s15 }
 0x932   : > { %p1565_p0 = scmp.lt.u32.totalorder %s1563_s20, %s1559_s23  ;;  %p1567_p5 = scmp.lt.u32.totalorder %s1559_s23, %s1945_s27 }
 0x933   : > { %p1561_p11 = pnand %p1560_p8, %p2029_p9 }
 0x934   : > { %p1566_p6 = por %p1565_p0, %p1564_p1 }
 0x935   : > { %p1562_p13 = pneg %p1561_p11 }
 0x936   : > { %p1568_p10 = por %p1567_p5, %p1566_p6 }
 0x938   : > { %p1569_p12 = pnand %p1568_p10, %p1562_p13 }
 0x93a   : > { %1572 = shalt.err (!%p1569_p12)
}
 0x93b   : > { %s1618_s17 = smov 128   ;;  %s1619_s26 = smov 8  }
 0x93c   : > { %1428 = dma.vmem_to_hbm [thread:$0]  (%p2029_p9), %s1947_s25, 256, %s1945_s27, %s1952_s22, %s1618_s17, %s1618_s17, %s1619_s26  }
 0x93d PF: > { %s2030_s16 = sld [smem:[#allocation8_spill]]  ;;  %s2031_s18 = sld [smem:[#allocation12_spill]] }
 0x93e   : > { %p1440_p2 = scmp.ge.s32.totalorder %s1611_s21, 2 }
 0x943   : > { %s1199_s29 = sand.u32 1, %s2030_s16   ;;  %p2032_p3 = scmp.ne.s32.totalorder %s2031_s18, 0 }
 0x944   : > { %s1200_s23 = scalar_lea.sflag [#allocation4], %s1199_s29 }
 0x945   : > { %p1435_p4 = pnand %p1440_p2, %p2032_p3 }
 0x947   : > { %1594 = dma.done.wait (!%p1435_p4), %s1200_s23, 256  }
 0x948   : > { %1596 = vsyncadd (!%p1435_p4), %s1200_s23, 4294967040  ;;  %s2033_s21 = sld [smem:[#allocation10_spill]]  ;;  %s2034_s20 = sld [smem:[#allocation9_spill]] }
 0x949   : > { %s2035_s24 = sld [smem:[#allocation11_spill]]  ;;  %s2036_s18 = smov %s1603_s19 }
 0x94e   : > { %p26_p7 = scmp.ge.s32.totalorder %s2033_s21, 4   ;;  %s2037_s19 = smov %s2034_s20 }
 0x94f   : > { %s2038_s20 = smov %s2035_s24 }
 0x950   :  { %28 = sbr.rel (!%p26_p7) target bundleno = 4 (0x4), region = 126 }
 0x957   :  { %1205 = vsyncpa [#allocation3], 1 }
 0x958   :  { %1207 = vsyncpa [#allocation3 + $0x1], 1 }
 0x959   :  { %1208 = vsyncpa [#allocation4], 1 }
 0x95a   :  { %1210 = vsyncpa [#allocation4 + $0x1], 1 }

// kernel: tpu_custom_call.1
= control target key start
LH: loop header
LB: loop body
LE: loop exit
PB: predicated region body
PF: predicated region fallthrough
CT: control target
= control target key end

     0   :  { %20 = vsyncpa [#allocation3], 0  ;;  %s1993_s0 = inlined_call_operand.vmem [shape: f32[2,16,32], index: 0, kind: input, shape index: {}]   ;;  %s1994_s1 = inlined_call_operand.vmem [shape: f32[2,8,32], index: 1, kind: input, shape index: {}]   ;;  %s1995_s2 = inlined_call_operand.vmem [shape: bf16[2,1,16,8], index: 2, kind: input, shape index: {}]   ;;  %s1996_s3 = inlined_call_operand.vmem [shape: f32[1,32], index: 3, kind: input, shape index: {}]   ;;  %s1997_s4 = inlined_call_operand.vmem [shape: f32[1,32], index: 4, kind: input, shape index: {}]   ;;  %s1998_s5 = inlined_call_operand.vmem [shape: bf16[32,32], index: 5, kind: input, shape index: {}]   ;;  %s1999_s6 = inlined_call_operand.hbm [shape: f32[1,32], index: 6, kind: input, shape index: {}]   ;;  %s2000_s7 = inlined_call_operand.vmem [shape: bf16[32,64], index: 7, kind: input, shape index: {}]   ;;  %s2001_s8 = inlined_call_operand.vmem [shape: f32[1,64], index: 8, kind: input, shape index: {}]   ;;  %s2002_s9 = inlined_call_operand.vmem [shape: bf16[32,32], index: 9, kind: input, shape index: {}]   ;;  %s2003_s10 = inlined_call_operand.vmem [shape: f32[1,32], index: 10, kind: input, shape index: {}]   ;;  %s2004_s11 = inlined_call_operand.vmem [shape: bf16[32,128], index: 11, kind: input, shape index: {}]   ;;  %s2005_s12 = inlined_call_operand.vmem [shape: f32[1,128], index: 12, kind: input, shape index: {}]   ;;  %s2006_s13 = inlined_call_operand.vmem [shape: bf16[128,32], index: 13, kind: input, shape index: {}]   ;;  %s2007_s14 = inlined_call_operand.vmem [shape: f32[1,32], index: 14, kind: input, shape index: {}]   ;;  %s2008_s15 = inlined_call_operand.hbm [shape: f32[2,16,32], index: 15, kind: output, shape index: {}]  }
   0x1   :  { %21 = vsyncpa [#allocation4], 0 }
   0x2   :  { %23 = vsyncpa [#allocation4 + $0x1], 0  ;;  %s1700_s18 = smov 0   ;;  %s1702_s19 = smov 0  }
   0x3   :  { %s1704_s20 = smov 0   ;;  %s1706_s21 = smov 0  }
   0x4 LB: > { %2017 = sst [smem:[#allocation8_spill]] %s1599_s18  ;;  %s1721_s22 = sadd.s32 4294967295, %s1611_s21   ;;  %s1611_s21 = sphi %s1706_s21, %s2033_s21   ;;  %s1607_s20 = sphi %s1704_s20, %s2038_s20   ;;  %s1603_s19 = sphi %s1702_s19, %s2037_s19   ;;  %s1599_s18 = sphi %s1700_s18, %s2036_s18  }
   0x5   : > { %2018 = sst [smem:[#allocation9_spill]] %s1607_s20  ;;  %s1282_s23 = sadd.s32 4294967294, %s1611_s21  }
   0x6   : > { %s1725_s24 = sadd.s32 1, %s1611_s21   ;;  %s366_s25 = sadd.s32 1, %s1607_s20 }
   0x7   : > { %2019 = sst [smem:[#allocation10_spill]] %s1725_s24  ;;  %s363_s26 = ssub.s32 %s1611_s21, %s1725_s24 }
   0x8   : > { %p376_p0 = scmp.ne.s32.totalorder %s1607_s20, %s1603_s19  ;;  %p364_p1 = scmp.eq.s32.totalorder %s363_s26, 0 }
   0x9   : > { %p377_p2 = scmp.eq.s32.totalorder %s1721_s22, 1  ;;  %p382_p3 = scmp.ne.s32.totalorder %s1603_s19, %s1599_s18 }
   0xa   : > { %p383_p4 = scmp.eq.s32.totalorder %s1282_s23, 1  ;;  %p1283_p7 = scmp.ge.s32.totalorder %s1611_s21, 1 }
   0xb   : > { %s1736_s27 = scalar_select %p364_p1, %s1607_s20, %s366_s25  }
   0xc   : > { %p1738_p5 = por %p377_p2, %p376_p0  ;;  %p1742_p6 = por %p383_p4, %p382_p3 }
   0xd   : > { %2020 = sst [smem:[#allocation11_spill]] %s1736_s27  ;;  %p390_p8 = scmp.lt.s32.totalorder %s1611_s21, 3 }
   0xe   : > { %s2021_s28 = scalar_select %p1738_p5, 1, 0 }
   0xf   : > { %s2022_s29 = scalar_select %p1742_p6, 1, 0 }
  0x10   : > { %p2014_p9 = scmp.eq.s32.totalorder %s1721_s22, 0  ;;  %p1749_p10 = pnand %p1283_p7, %p390_p8 }
  0x11   : > { %2023 = sst [smem:[#allocation12_spill]] %s2022_s29  ;;  %s1613_s16 = smov [#allocation2]  }
  0x12   : > { %s2024_s30 = scalar_select %p1749_p10, 1, 0 }
  0x13   : > { %s412_s17 = sshll.u32 %s1613_s16, 4  ;;  %p1430_p11 = pneg %p1749_p10  ;;  %s413_s17 = int_to_ptr.vmem [resolvable:$true] %s412_s17 }
  0x14   : > { %s1517_s27 = scalar_lea.hbm %s1999_s6, 16 }
  0x15   : > { %p1757_p12 = pnand %p2014_p9, %p1430_p11  ;;  %p1518_p13 = scmp.ne.s32.totalorder %s1999_s6, %s1517_s27 }
  0x16   : > { %p1524_p3 = scmp.lt.u32.totalorder %s1517_s27, %s1999_s6 }
  0x17   : > { %p1519_p0 = pneg %p1757_p12 }
  0x19   : > { %p1520_p1 = pnand %p1519_p0, %p1518_p13 }
  0x1b   : > { %p1521_p2 = pneg %p1520_p1 }
  0x1d   : > { %p1526_p4 = pnand %p1524_p3, %p1521_p2 }
  0x1f   : > { %1529 = shalt.err (!%p1526_p4)
}
  0x20   : > { %s1530_s18 = scalar_lea.vmem %s413_s17, 16  ;;  %s1537_s25 = scalar_lea.vmem %s413_s17, 32 }
  0x21   : > { %p1531_p7 = scmp.ne.s32.totalorder %s413_s17, %s1530_s18  ;;  %p1538_p9 = scmp.lt.s32.totalorder %s413_s17, %s413_s17 }
  0x22   : > { %p1539_p6 = scmp.lt.s32.totalorder %s1537_s25, %s1530_s18 }
  0x23   : > { %p1533_p8 = pnand %p1531_p7, %p1519_p0 }
  0x24   : > { %p1540_p5 = por %p1539_p6, %p1538_p9 }
  0x25   : > { %p1534_p11 = pneg %p1533_p8 }
  0x27   : > { %p1541_p10 = pnand %p1540_p5, %p1534_p11 }
  0x29   : > { %1544 = shalt.err (!%p1541_p10)
}
  0x2a   : > { %1433 = dma.hbm_to_vmem [thread:$0]  (!%p1757_p12), %s1999_s6, 16, %s413_s17, [#allocation3]  }
  0x2b   : > { %p2026_p13 = scmp.ne.s32.totalorder %s2024_s30, 0 }
  0x2c   : > { %p2027_p1 = scmp.eq.s32.totalorder (!%p2026_p13), %s1721_s22, 0 }
  0x2d   : > { %472 = sbr.rel (%p2026_p13) target bundleno = 2365 (0x93d), region = 80 }
  0x34   : > { %1590 = dma.done.wait (%p2027_p1), [#allocation3], 16   ;;  %p2028_p0 = pmov %p2027_p1 }
  0x35   : > { %p529_p6 = scmp.lt.s32.totalorder %s1721_s22, 1  ;;  %vm547_vm0 = vcmask 261120   ;;  %v1479_v21 = vld [vmem:[%s1998_s5] sm:$0xff]   ;;  %v1614_v22 = vmov 0.0   ;;  %v1480_v23 = vld [vmem:[%s1998_s5 + $0x8] sm:$0xff]   ;;  %vm1615_vm1 = vmmov 0  }
  0x36   : > { %1592 = vsyncadd (%p2028_p0), [#allocation3], 4294967280  ;;  %1360 = vmatprep.subr.bf16.mxu1 %v1614_v22  ;;  %1388 = vmatprep.subr.bf16.mxu0 %v1614_v22  ;;  %v1294_v37 = vld [vmem:[%s1996_s3] ss:$0 sm:$0xff]  ;;  %v1482_v44 = vld [vmem:[%s2000_s7 + $0x8] sm:$0xff]   ;;  %vm796_vm2 = vcmask 64512  }
  0x37   : > { %s1785_s18 = scalar_select %p529_p6, %s1721_s22, 1  ;;  %1361 = vmatpush3.bf16.msra.mxu1 %v1479_v21  ;;  %1364 = vmatprep.mubr.msk.bf16.mxu1 %vm1615_vm1, %v1614_v22  ;;  %v1481_v40 = vld [vmem:[%s2000_s7] sm:$0xff]   ;;  %vm826_vm3 = vcmask 1043456  }
  0x38   : > { %1362 = vmatprep.subr.bf16.mxu1 %v1614_v22  ;;  %1392 = vmatprep.mubr.msk.bf16.mxu0 %vm1615_vm1, %v1614_v22  ;;  %v1295_v43 = vld [vmem:[%s1997_s4] ss:$0 sm:$0xff]  ;;  %s526_s23 = sand.u32 1, %s1603_s19   ;;  %p2029_p9 = scmp.ne.s32.totalorder %s2021_s28, 0 }
  0x39   : > { %s1328_s27 = sshll.u32 %s1785_s18, 4  ;;  %s1291_s29 = sshll.u32 %s1785_s18, 3  ;;  %v1296_v47 = vld [vmem:[#allocation2] ss:$0 sm:$0xff] }
  0x3a   : > { %s533_s30 = scalar_lea.vmem %s1993_s0, %s1328_s27  ;;  %s537_s25 = scalar_lea.vmem %s1994_s1, %s1291_s29  ;;  %v1300_v55 = vld [vmem:[%s2001_s8] ss:$0 sm:$0xff] }
  0x3b   : > { %v1797_v0 = vld [vmem:[%s533_s30] sm:$0xff]  ;;  %v1802_v4 = vld [vmem:[%s533_s30 + $0x8] sm:$0xff]  ;;  %1363 = vmatpush3.bf16.msra.mxu1 %v1480_v23  ;;  %s542_s16 = scalar_lea.vmem %s1995_s2, %s1291_s29  ;;  %s1616_s18 = smov 96  }
  0x3c   : > { %v546_v1 = vld [vmem:[%s537_s25] sm:$0xff]  ;;  %v548_v2 = vsel %vm547_vm0, %v1797_v0, 0.0  ;;  %v551_v5 = vsel %vm547_vm0, %v1802_v4, 0.0  ;;  %1368 = vmatprep.subr.bf16.mxu1 %v1614_v22  ;;  %s1288_s30 = sshll.u32 %s526_s23, 4 }
  0x3d   : > { %v576_v3 = vsel %vm547_vm0, %v546_v1, 0.0  ;;  %549 = vadd.xlane.f32.xlu0 %v548_v2  ;;  %v1332_v63 = vld [vmem:[%s542_s16] sm:$0xff]   ;;  %s528_s29 = scalar_lea.vmem [#allocation5], %s1288_s30  ;;  %s1617_s30 = smov [#allocation5]  }
  0x3e   : > { %577 = vadd.xlane.f32.xlu1 %v576_v3  ;;  %s1184_s25 = sshll.u32 %s528_s29, 4  ;;  %s1549_s26 = sshll.u32 %s1617_s30, 4  ;;  %s1947_s25 = int_to_ptr.vmem [resolvable:$true] %s1184_s25  ;;  %s1550_s26 = int_to_ptr.vmem [resolvable:$false] %s1549_s26 }
  0x3f   : > { %s1545_s17 = scalar_lea.vmem %s1947_s25, 256  ;;  %s1551_s16 = scalar_lea.vmem %s1550_s26, 512 }
  0x40   : > { %p1546_p5 = scmp.ne.s32.totalorder %s1947_s25, %s1545_s17  ;;  %p1552_p2 = scmp.lt.s32.totalorder %s1947_s25, %s1550_s26 }
  0x41   : > { %552 = vadd.xlane.f32.xlu0 %v551_v5  ;;  %p1553_p3 = scmp.lt.s32.totalorder %s1551_s16, %s1545_s17 }
  0x42   : > { %p1547_p10 = pnand %p1546_p5, %p2029_p9 }
  0x43   : > { %p1554_p4 = por %p1553_p3, %p1552_p2 }
  0x44   : > { %p1548_p12 = pneg %p1547_p10 }
  0x46   : > { %p1555_p7 = pnand %p1554_p4, %p1548_p12 }
  0xca   : > { %v550_v6 = vpop.xlane.xlu0 %549 }
  0xcb   : > { %v578_v7 = vpop.xlane.xlu1 %577  ;;  %v555_v8 = vmul.f32 0.03125, %v550_v6  ;;  %v1334_v6 = vunpack.c.h.bf16 %v1332_v63 }
  0xcc   : > { %v579_v9 = vmul.f32 0.03125, %v578_v7 }
  0xcd   : > { %v557_v10 = vsub.f32 %v1797_v0, %v555_v8 }
  0xce   : > { %v580_v11 = vsub.f32 %v546_v1, %v579_v9  ;;  %v553_v12 = vpop.xlane.xlu0 %552  ;;  %v1333_v1 = vunpack.c.l.bf16 %v1332_v63 }
  0xcf   : > { %v556_v13 = vmul.f32 0.03125, %v553_v12  ;;  %v559_v14 = vmul.f32 %v557_v10, %v557_v10 }
  0xd0   : > { %v581_v15 = vmul.f32 %v580_v11, %v580_v11 }
  0xd1   : > { %v558_v16 = vsub.f32 %v1802_v4, %v556_v13  ;;  %v561_v17 = vsel %vm547_vm0, %v559_v14, 0.0 }
  0xd2   : > { %562 = vadd.xlane.f32.xlu1 %v561_v17  ;;  %v582_v18 = vsel %vm547_vm0, %v581_v15, 0.0 }
  0xd3   : > { %v560_v19 = vmul.f32 %v558_v16, %v558_v16 }
  0xd5   : > { %v564_v20 = vsel %vm547_vm0, %v560_v19, 0.0 }
  0xd6   : > { %583 = vadd.xlane.f32.xlu1 %v582_v18  ;;  %565 = vadd.xlane.f32.xlu0 %v564_v20 }
 0x15f   : > { %v563_v24 = vpop.xlane.xlu1 %562 }
 0x160   : > { %v567_v25 = vmul.f32 0.03125, %v563_v24 }
 0x162   : > { %v569_v26 = vadd.f32 1e-06, %v567_v25  ;;  %v1483_v25 = vld [vmem:[%s2002_s9] sm:$0xff]  }
 0x163   : > { %v584_v27 = vpop.xlane.xlu1 %583  ;;  %v566_v28 = vpop.xlane.xlu0 %565  ;;  %1389 = vmatpush3.bf16.msra.mxu0 %v1483_v25 }
 0x164   : > { %v585_v29 = vmul.f32 0.03125, %v584_v27  ;;  %v568_v30 = vmul.f32 0.03125, %v566_v28  ;;  %1495 = vrsqrt.f32 %v569_v26  ;;  %1390 = vmatprep.subr.bf16.mxu0 %v1614_v22 }
 0x166   : > { %v586_v31 = vadd.f32 1e-05, %v585_v29  ;;  %v570_v32 = vadd.f32 1e-06, %v568_v30 }
 0x168   : > { %1497 = vrsqrt.f32 %v586_v31 }
 0x169   : > { %1499 = vrsqrt.f32 %v570_v32 }
 0x16e   : > { %v1496_v33 = vpop.eup %1495 }
 0x16f   : > { %v573_v38 = vmul.f32 %v1496_v33, %v557_v10 }
 0x172   : > { %v1498_v34 = vpop.eup %1497 }
 0x173   : > { %v1500_v35 = vpop.eup %1499  ;;  %v588_v36 = vmul.f32 %v1498_v34, %v580_v11 }
 0x174   : > { %v574_v39 = vmul.f32 %v1500_v35, %v558_v16  ;;  %v1484_v35 = vld [vmem:[%s2002_s9 + $0x8] sm:$0xff]  }
 0x175   : > { %v596_v42 = vmul.f32 %v1294_v37, %v588_v36  ;;  %1391 = vmatpush3.bf16.msra.mxu0 %v1484_v35 }
 0x176   : > { %v575_v41 = vpack.c.bf16 %v574_v39, %v573_v38  ;;  %1404 = vmatprep.subr.bf16.mxu0 %v1614_v22 }
 0x177   : > { %v604_v45 = vadd.f32 %v1295_v43, %v596_v42 }
 0x178   : > { %1365 = vmatmul.mubr.msk.bf16.vlgmr.msra.gmra.mrb[0].mxu1 %vm547_vm0, %v575_v41  ;;  %v1306_v41 = vld [vmem:[%s2003_s10] ss:$0 sm:$0xff] }
 0x179   : > { %1369 = vmatpush3.bf16.msra.mxu1 %v1481_v40  ;;  %1372 = vmatprep.mubr.msk.bf16.mxu1 %vm1615_vm1, %v1614_v22  ;;  %v605_v46 = vpack.c.bf16 %v604_v45, %v604_v45 }
 0x17a   : > { %1370 = vmatprep.subr.bf16.mxu1 %v1614_v22 }
 0x17d   : > { %1371 = vmatpush3.bf16.msra.mxu1 %v1482_v44 }
 0x17e   : > { %1376 = vmatprep.subr.bf16.mxu1 %v1614_v22 }
 0x180   : > { %1373 = vmatmul.mubr.msk.bf16.vlgmr.msra.gmra.mrb[4].mxu1 %vm547_vm0, %v605_v46 }
 0x181   : > { %1378 = vmatprep.mubr.msk.bf16.mxu1 %vm1615_vm1, %v1614_v22 }
 0x24b   : > { %v666_v48 = vpop.f32.mrb[0].mxu1 }
 0x24c   : > { %v1366_v49 = vpop.f32.mrb[1].mxu1  ;;  %v667_v51 = vadd.f32 %v1296_v47, %v666_v48 }
 0x24d   : > { %v669_v50 = vpop.f32.mrb[2].mxu1 }
 0x24e   : > { %v670_v52 = vadd.f32 %v1296_v47, %v669_v50  ;;  %v1367_v53 = vpop.f32.mrb[3].mxu1 }
 0x250   : > { %v741_v54 = vpack.c.bf16 %v670_v52, %v667_v51 }
 0x253   : > { %v733_v56 = vpop.f32.mrb[4].mxu1 }
 0x254   : > { %v734_v57 = vadd.f32 %v1300_v55, %v733_v56  ;;  %v1374_v58 = vpop.f32.mrb[5].mxu1 }
 0x255   : > { %v736_v59 = vpop.f32.mrb[6].mxu1 }
 0x256   : > { %v742_v60 = vpack.c.bf16 %v734_v57, %v734_v57  ;;  %v1375_v61 = vpop.f32.mrb[7].mxu1 }
 0x257   : > { %v1486_v61 = vld [vmem:[%s2004_s11 + $0x8] sm:$0xff]  }
 0x258   : > { %v747_v62 = vsel %vm547_vm0, %v742_v60, 0 }
 0x259   : > { %1377 = vmatpush3.bf16.xpose.msra.mxu1 %v747_v62 }
 0x25a   : > { %1382 = vmatprep.subr.bf16.mxu1 %v1614_v22 }
 0x260   : > { %1379 = vmatmul.mubr.msk.bf16.vlgmr.msra.gmra.mrb[8].mxu1 %vm547_vm0, %v741_v54 }
 0x261   : > { %1384 = vmatprep.mubr.msk.bf16.mxu1 %vm1615_vm1, %v1614_v22 }
 0x333   : > { %v783_v2 = vpop.f32.mrb[8].mxu1 }
 0x334   : > { %v790_v3 = vmul.f32 0.17677669, %v783_v2  ;;  %v1380_v5 = vpop.f32.mrb[9].mxu1 }
 0x335   : > { %v786_v7 = vpop.f32.mrb[10].mxu1 }
 0x336   : > { %v791_v8 = vmul.f32 0.17677669, %v786_v7  ;;  %v1381_v9 = vpop.f32.mrb[11].mxu1  ;;  %v794_v10 = vadd.f32 %v1333_v1, %v790_v3 }
 0x338   : > { %v797_v11 = vsel %vm796_vm2, %v794_v10, -inf  ;;  %v795_v12 = vadd.f32 %v1334_v6, %v791_v8 }
 0x339   : > { %798 = vmax.xlane.f32.xlu0 %v797_v11  ;;  %v1487_v11 = vld [vmem:[%s2006_s13] sm:$0xff]  }
 0x33a   : > { %v800_v13 = vsel %vm796_vm2, %v795_v12, -inf }
 0x33b   : > { %801 = vmax.xlane.f32.xlu1 %v800_v13  ;;  %v1489_v13 = vld [vmem:[%s2006_s13 + $0x10] sm:$0xff]  }
 0x3c6   : > { %v799_v14 = vpop.xlane.xlu0 %798 }
 0x3c7   : > { %v803_v15 = vsub.f32 %v794_v10, %v799_v14  ;;  %v1490_v14 = vld [vmem:[%s2006_s13 + $0x18] sm:$0xff]  }
 0x3c8   : > { %v802_v16 = vpop.xlane.xlu1 %801 }
 0x3c9   : > { %v805_v17 = vmul.f32 1.442695, %v803_v15  ;;  %v804_v18 = vsub.f32 %v795_v12, %v802_v16  ;;  %v1488_v12 = vld [vmem:[%s2006_s13 + $0x8] sm:$0xff]   ;;  %v1491_v15 = vld [vmem:[%s2006_s13 + $0x20] sm:$0xff]  }
 0x3ca   : > { %v1492_v16 = vld [vmem:[%s2006_s13 + $0x28] sm:$0xff]  }
 0x3cb   : > { %1501 = vpow2.f32 %v805_v17  ;;  %v807_v19 = vmul.f32 1.442695, %v804_v18  ;;  %v1493_v17 = vld [vmem:[%s2006_s13 + $0x30] sm:$0xff]   ;;  %v1494_v18 = vld [vmem:[%s2006_s13 + $0x38] sm:$0xff]  }
 0x3cd   : > { %1503 = vpow2.f32 %v807_v19  ;;  %v1310_v19 = vld [vmem:[%s2005_s12] ss:$0 sm:$0xff] }
 0x3d5   : > { %v1502_v20 = vpop.eup %1501 }
 0x3d6   : > { %v809_v21 = vsel %vm796_vm2, %v1502_v20, 0.0 }
 0x3d7   : > { %v1504_v23 = vpop.eup %1503  ;;  %810 = vadd.xlane.f32.xlu0 %v809_v21 }
 0x3d8   : > { %v812_v24 = vsel %vm796_vm2, %v1504_v23, 0.0 }
 0x3d9   : > { %813 = vadd.xlane.f32.xlu1 %v812_v24 }
 0x3ed   : > { %821 = vrot.lane.b32.xlu0 %v742_v60, %s1616_s18  ;;  %v1485_v60 = vld [vmem:[%s2004_s11] sm:$0xff]   ;;  %s1330_s18 = sshll.u32 %s1721_s22, 8  ;;  %s1952_s22 = scalar_lea.sflag [#allocation4], %s526_s23 }
 0x3ee   : > { %s1945_s27 = scalar_lea.hbm %s2008_s15, %s1330_s18 }
 0x464   : > { %v811_v26 = vpop.xlane.xlu0 %810 }
 0x465   : > { %1505 = vrcp.f32 %v811_v26 }
 0x466   : > { %v814_v27 = vpop.xlane.xlu1 %813 }
 0x467   : > { %1507 = vrcp.f32 %v814_v27 }
 0x468   : > { %v822_v28 = vpop.permute.xlu0 %821 }
 0x469   : > { %v828_v29 = vsel %vm826_vm3, %v822_v28, 0 }
 0x46a   : > { %1383 = vmatpush3.bf16.msra.mxu1 %v828_v29 }
 0x46b   : > { %1396 = vmatprep.subr.bf16.mxu1 %v1614_v22 }
 0x46f   : > { %v1506_v30 = vpop.eup %1505 }
 0x470   : > { %v817_v32 = vmul.f32 %v1506_v30, %v1502_v20 }
 0x471   : > { %v1508_v31 = vpop.eup %1507 }
 0x472   : > { %v818_v33 = vmul.f32 %v1508_v31, %v1504_v23 }
 0x474   : > { %v819_v34 = vpack.c.bf16 %v818_v33, %v817_v32 }
 0x476   : > { %1385 = vmatmul.mubr.msk.bf16.vlgmr.msra.gmra.mrb[12].mxu1 %vm796_vm2, %v819_v34 }
 0x477   : > { %1400 = vmatprep.mubr.msk.bf16.mxu1 %vm1615_vm1, %v1614_v22  ;;  %1397 = vmatpush3.bf16.msra.mxu1 %v1485_v60 }
 0x478   : > { %1398 = vmatprep.subr.bf16.mxu1 %v1614_v22 }
 0x47b   : > { %1399 = vmatpush3.bf16.msra.mxu1 %v1486_v61 }
 0x549   : > { %v864_v36 = vpop.f32.mrb[12].mxu1 }
 0x54a   : > { %v1386_v37 = vpop.f32.mrb[13].mxu1 }
 0x54b   : > { %v867_v38 = vpop.f32.mrb[14].mxu1 }
 0x54c   : > { %v871_v39 = vpack.c.bf16 %v867_v38, %v864_v36  ;;  %v1387_v40 = vpop.f32.mrb[15].mxu1 }
 0x54e   : > { %1393 = vmatmul.mubr.msk.bf16.vlgmr.msra.gmra.mrb[0].mxu0 %vm547_vm0, %v871_v39 }
 0x54f   : > { %1420 = vmatprep.mubr.msk.bf16.mxu0 %vm1615_vm1, %v1614_v22  ;;  %1405 = vmatpush3.bf16.msra.mxu0 %v1487_v11 }
 0x550   : > { %1406 = vmatprep.subr.bf16.mxu0 %v1614_v22 }
 0x553   : > { %1407 = vmatpush3.bf16.msra.mxu0 %v1488_v12 }
 0x554   : > { %1408 = vmatprep.subr.bf16.mxu0 %v1614_v22 }
 0x557   : > { %1409 = vmatpush3.bf16.msra.mxu0 %v1489_v13 }
 0x558   : > { %1410 = vmatprep.subr.bf16.mxu0 %v1614_v22 }
 0x55b   : > { %1411 = vmatpush3.bf16.msra.mxu0 %v1490_v14 }
 0x55c   : > { %1412 = vmatprep.subr.bf16.mxu0 %v1614_v22 }
 0x55f   : > { %1413 = vmatpush3.bf16.msra.mxu0 %v1491_v15 }
 0x560   : > { %1414 = vmatprep.subr.bf16.mxu0 %v1614_v22 }
 0x563   : > { %1415 = vmatpush3.bf16.msra.mxu0 %v1492_v16 }
 0x564   : > { %1416 = vmatprep.subr.bf16.mxu0 %v1614_v22 }
 0x567   : > { %1417 = vmatpush3.bf16.msra.mxu0 %v1493_v17 }
 0x568   : > { %1418 = vmatprep.subr.bf16.mxu0 %v1614_v22 }
 0x56b   : > { %1419 = vmatpush3.bf16.msra.mxu0 %v1494_v18 }
 0x621   : > { %v932_v42 = vpop.f32.mrb[0].mxu0 }
 0x622   : > { %v933_v43 = vadd.f32 %v1306_v41, %v932_v42  ;;  %v1394_v44 = vpop.f32.mrb[1].mxu0 }
 0x623   : > { %v935_v45 = vpop.f32.mrb[2].mxu0 }
 0x624   : > { %v1881_v46 = vadd.f32 %v933_v43, %v1797_v0  ;;  %v936_v47 = vadd.f32 %v1306_v41, %v935_v45  ;;  %v1395_v48 = vpop.f32.mrb[3].mxu0  ;;  %v1314_v45 = vld [vmem:[%s2007_s14] ss:$0 sm:$0xff] }
 0x626   : > { %v1884_v49 = vadd.f32 %v936_v47, %v1802_v4  ;;  %v941_v50 = vsel %vm547_vm0, %v1881_v46, 0.0 }
 0x627   : > { %942 = vadd.xlane.f32.xlu1 %v941_v50 }
 0x628   : > { %v944_v51 = vsel %vm547_vm0, %v1884_v49, 0.0 }
 0x62b   : > { %945 = vadd.xlane.f32.xlu1 %v944_v51 }
 0x6b4   : > { %v943_v52 = vpop.xlane.xlu1 %942 }
 0x6b5   : > { %v947_v53 = vmul.f32 0.03125, %v943_v52 }
 0x6b7   : > { %v949_v54 = vsub.f32 %v1881_v46, %v947_v53 }
 0x6b8   : > { %v946_v55 = vpop.xlane.xlu1 %945 }
 0x6b9   : > { %v948_v0 = vmul.f32 0.03125, %v946_v55  ;;  %v951_v56 = vmul.f32 %v949_v54, %v949_v54 }
 0x6bb   : > { %v950_v57 = vsub.f32 %v1884_v49, %v948_v0  ;;  %v953_v4 = vsel %vm547_vm0, %v951_v56, 0.0 }
 0x6bc   : > { %954 = vadd.xlane.f32.xlu1 %v953_v4 }
 0x6bd   : > { %v952_v58 = vmul.f32 %v950_v57, %v950_v57 }
 0x6bf   : > { %v956_v59 = vsel %vm547_vm0, %v952_v58, 0.0 }
 0x6c0   : > { %957 = vadd.xlane.f32.xlu1 %v956_v59 }
 0x749   : > { %v955_v62 = vpop.xlane.xlu1 %954 }
 0x74a   : > { %v959_v63 = vmul.f32 0.03125, %v955_v62 }
 0x74c   : > { %v961_v1 = vadd.f32 1e-06, %v959_v63 }
 0x74d   : > { %v958_v2 = vpop.xlane.xlu1 %957 }
 0x74e   : > { %v960_v3 = vmul.f32 0.03125, %v958_v2  ;;  %1509 = vrsqrt.f32 %v961_v1 }
 0x750   : > { %v962_v5 = vadd.f32 1e-06, %v960_v3 }
 0x752   : > { %1511 = vrsqrt.f32 %v962_v5 }
 0x758   : > { %v1510_v6 = vpop.eup %1509 }
 0x759   : > { %v965_v8 = vmul.f32 %v1510_v6, %v949_v54 }
 0x75c   : > { %v1512_v7 = vpop.eup %1511 }
 0x75d   : > { %v966_v9 = vmul.f32 %v1512_v7, %v950_v57 }
 0x75f   : > { %v967_v10 = vpack.c.bf16 %v966_v9, %v965_v8 }
 0x761   : > { %1401 = vmatmul.mubr.msk.bf16.vlgmr.msra.gmra.mrb[16].mxu1 %vm547_vm0, %v967_v10 }
 0x834   : > { %v1028_v20 = vpop.f32.mrb[16].mxu1 }
 0x835   : > { %v1029_v21 = vadd.f32 %v1310_v19, %v1028_v20  ;;  %v1402_v23 = vpop.f32.mrb[17].mxu1 }
 0x836   : > { %v1031_v24 = vpop.f32.mrb[18].mxu1 }
 0x837   : > { %v1037_v25 = vmul.f32 0.044715, %v1029_v21  ;;  %v1032_v26 = vadd.f32 %v1310_v19, %v1031_v24  ;;  %v1403_v27 = vpop.f32.mrb[19].mxu1  ;;  %v1035_v39 = vmul.f32 0.5, %v1029_v21 }
 0x839   : > { %v1039_v28 = vmul.f32 %v1037_v25, %v1029_v21  ;;  %v1038_v29 = vmul.f32 0.044715, %v1032_v26  ;;  %v1036_v40 = vmul.f32 0.5, %v1032_v26 }
 0x83b   : > { %v1041_v30 = vmul.f32 %v1039_v28, %v1029_v21  ;;  %v1040_v31 = vmul.f32 %v1038_v29, %v1032_v26 }
 0x83d   : > { %v1043_v32 = vadd.f32 %v1041_v30, %v1029_v21  ;;  %v1042_v33 = vmul.f32 %v1040_v31, %v1032_v26 }
 0x83f   : > { %v1045_v22 = vmul.f32 0.7978846, %v1043_v32  ;;  %v1044_v34 = vadd.f32 %v1042_v33, %v1032_v26 }
 0x841   : > { %1513 = vtanh.f32 %v1045_v22  ;;  %v1046_v35 = vmul.f32 0.7978846, %v1044_v34 }
 0x843   : > { %1515 = vtanh.f32 %v1046_v35 }
 0x84b   : > { %v1514_v36 = vpop.eup %1513 }
 0x84c   : > { %v1049_v37 = vadd.f32 1.0, %v1514_v36 }
 0x84d   : > { %v1516_v38 = vpop.eup %1515 }
 0x84e   : > { %v1050_v41 = vadd.f32 1.0, %v1516_v38  ;;  %v1051_v42 = vmul.f32 %v1049_v37, %v1035_v39 }
 0x850   : > { %v1052_v43 = vmul.f32 %v1050_v41, %v1036_v40 }
 0x852   : > { %v1053_v44 = vpack.c.bf16 %v1052_v43, %v1051_v42 }
 0x854   : > { %1421 = vmatmul.mubr.bf16.vlgmr.msra.gmra.mrb[4].mxu0 %v1053_v44 }
 0x927   : > { %v1159_v47 = vpop.f32.mrb[4].mxu0 }
 0x928   : > { %v1160_v48 = vadd.f32 %v1314_v45, %v1159_v47  ;;  %v1422_v50 = vpop.f32.mrb[5].mxu0 }
 0x929   : > { %v1162_v51 = vpop.f32.mrb[6].mxu0 }
 0x92a   : > { %v1166_v52 = vadd.f32 %v1160_v48, %v1881_v46  ;;  %v1163_v53 = vadd.f32 %v1314_v45, %v1162_v51  ;;  %v1423_v54 = vpop.f32.mrb[7].mxu0 }
 0x92c   : > { %1168 = vst.msk [vmem:[%s528_s29] sm:$0xff] %vm547_vm0, %v1166_v52  ;;  %v1167_v55 = vadd.f32 %v1163_v53, %v1884_v49 }
 0x92e   : > { %1169 = vst.msk [vmem:[%s528_s29 + $0x8] sm:$0xff] %vm547_vm0, %v1167_v55 }
 0x92f   : > { %1558 = shalt.err (!%p1555_p7)
}
 0x930   : > { %s1559_s23 = scalar_lea.hbm %s1945_s27, 256  ;;  %s1563_s20 = scalar_lea.hbm %s2008_s15, 512 }
 0x931   : > { %p1560_p8 = scmp.ne.s32.totalorder %s1945_s27, %s1559_s23  ;;  %p1564_p1 = scmp.lt.u32.totalorder %s1945_s27, %s2008_s15 }
 0x932   : > { %p1565_p0 = scmp.lt.u32.totalorder %s1563_s20, %s1559_s23  ;;  %p1567_p5 = scmp.lt.u32.totalorder %s1559_s23, %s1945_s27 }
 0x933   : > { %p1561_p11 = pnand %p1560_p8, %p2029_p9 }
 0x934   : > { %p1566_p6 = por %p1565_p0, %p1564_p1 }
 0x935   : > { %p1562_p13 = pneg %p1561_p11 }
 0x936   : > { %p1568_p10 = por %p1567_p5, %p1566_p6 }
 0x938   : > { %p1569_p12 = pnand %p1568_p10, %p1562_p13 }
 0x93a   : > { %1572 = shalt.err (!%p1569_p12)
}
 0x93b   : > { %s1618_s17 = smov 128   ;;  %s1619_s26 = smov 8  }
 0x93c   : > { %1428 = dma.vmem_to_hbm [thread:$0]  (%p2029_p9), %s1947_s25, 256, %s1945_s27, %s1952_s22, %s1618_s17, %s1618_s17, %s1619_s26  }
 0x93d PF: > { %s2030_s16 = sld [smem:[#allocation8_spill]]  ;;  %s2031_s18 = sld [smem:[#allocation12_spill]] }
 0x93e   : > { %p1440_p2 = scmp.ge.s32.totalorder %s1611_s21, 2 }
 0x943   : > { %s1199_s29 = sand.u32 1, %s2030_s16   ;;  %p2032_p3 = scmp.ne.s32.totalorder %s2031_s18, 0 }
 0x944   : > { %s1200_s23 = scalar_lea.sflag [#allocation4], %s1199_s29 }
 0x945   : > { %p1435_p4 = pnand %p1440_p2, %p2032_p3 }
 0x947   : > { %1594 = dma.done.wait (!%p1435_p4), %s1200_s23, 256  }
 0x948   : > { %1596 = vsyncadd (!%p1435_p4), %s1200_s23, 4294967040  ;;  %s2033_s21 = sld [smem:[#allocation10_spill]]  ;;  %s2034_s20 = sld [smem:[#allocation9_spill]] }
 0x949   : > { %s2035_s24 = sld [smem:[#allocation11_spill]]  ;;  %s2036_s18 = smov %s1603_s19 }
 0x94e   : > { %p26_p7 = scmp.ge.s32.totalorder %s2033_s21, 4   ;;  %s2037_s19 = smov %s2034_s20 }
 0x94f   : > { %s2038_s20 = smov %s2035_s24 }
 0x950   :  { %28 = sbr.rel (!%p26_p7) target bundleno = 4 (0x4), region = 126 }
 0x957   :  { %1205 = vsyncpa [#allocation3], 1 }
 0x958   :  { %1207 = vsyncpa [#allocation3 + $0x1], 1 }
 0x959   :  { %1208 = vsyncpa [#allocation4], 1 }
 0x95a   :  { %1210 = vsyncpa [#allocation4 + $0x1], 1 }

</bundles_post_ra>
